<compile_context>
chip_gen: v7x
topology: tpu7x:2x2x1
jax: 0.10.0
libtpu: 0.0.40
codegen_flags: <defaults>
</compile_context>

<pallas_src>
import math

import jax
import jax.numpy as jnp
from jax.experimental import pallas as pl
from jax.experimental.pallas import tpu as pltpu


# ---------------------------------------------------------------------------
# Config (batch fixed to 25 by the hard-coded MyView((25, -1, 1, 1))).
# ---------------------------------------------------------------------------
B = 25
CIN = 3
H = W = 44                                  # conv1 out 12x12 -> pool(6) -> 2x2
C1 = 32                                     # conv1 out channels (2048 in ref)
KS, STRIDE, PAD = 7, 4, 4
POOL = 6
HO = (H + 2 * PAD - KS) // STRIDE + 1       # 12
WO = (W + 2 * PAD - KS) // STRIDE + 1       # 12
HP, WP = HO // POOL, WO // POOL             # 2, 2
CF = C1 * HP * WP                           # 128 = fc1 in-features
F1 = 128                                    # fc1 out channels
DT = jnp.float32

# space-to-depth (stride-phase) geometry used by the in-kernel conv
QH = (H + 2 * PAD) // STRIDE                # 13 phase rows
QW = (W + 2 * PAD) // STRIDE                # 13 phase cols
LSD = STRIDE * STRIDE * CIN                 # 48 lanes = (sh, sw, cin)
NT = (HO - 1) * QW + WO                     # 155 "virtual" patch rows t = ho*QW + wo

assert (H + 2 * PAD) % STRIDE == 0 and (W + 2 * PAD) % STRIDE == 0
assert KS <= 2 * STRIDE                     # every kernel tap reachable with ah, aw in {0, 1}
assert HO % POOL == 0 and WO % POOL == 0


# ---------------------------------------------------------------------------
# Fused kernel: conv1 -> gdn1 -> maxpool -> flatten -> fc1 -> gdn2 -> fc2,
# one image per grid step.
# ---------------------------------------------------------------------------
def _meon_kernel(x_ref, wc_ref, bc_ref, g1_ref, bt1_ref,
                 w1_ref, b1_ref, g2_ref, bt2_ref, w2_ref, b2_ref, o_ref):
    # x_ref : (1, QH*QW, LSD)  space-to-depth phase tensor of the padded image
    #         x_ref[0, qh*QW+qw, (sh*4+sw)*3+cin] = xpad[cin, 4*qh+sh, 4*qw+sw]
    # wc_ref: (2, 2, LSD, C1)  conv1 weight grouped by (ah, aw) row/col shift
    # o_ref : (1, 1, 1)
    f32 = jnp.float32

    # ---- conv1 (7x7, stride 4): 4 contiguous row-shifted slices x 4 MXU matmuls
    # rows of `conv`: t = ho*QW + wo  (rows with wo == QW-1 are unused filler)
    conv = jnp.dot(x_ref[0, 0:NT, :], wc_ref[0, 0], preferred_element_type=f32)
    conv = conv + jnp.dot(x_ref[0, 1:NT + 1, :], wc_ref[0, 1],
                          preferred_element_type=f32)
    conv = conv + jnp.dot(x_ref[0, QW:QW + NT, :], wc_ref[1, 0],
                          preferred_element_type=f32)
    conv = conv + jnp.dot(x_ref[0, QW + 1:QW + 1 + NT, :], wc_ref[1, 1],
                          preferred_element_type=f32)
    conv = conv + bc_ref[...]                                   # (NT, C1)

    # ---- gdn1: y = x / sqrt(beta + x^2 @ gamma) ------------------------------
    d1 = jnp.dot(conv * conv, g1_ref[...], preferred_element_type=f32) + bt1_ref[...]
    y1 = conv * jax.lax.rsqrt(d1)                               # (NT, C1)

    # ---- 6x6 max-pool: VPU maximum tree over contiguous row slices ------------
    def pool_rows(h0):                       # max over ho in [h0, h0+POOL)
        m = y1[QW * h0:QW * h0 + WO, :]
        for i in range(1, POOL):
            r0 = QW * (h0 + i)
            m = jnp.maximum(m, y1[r0:r0 + WO, :])
        return m                             # (WO, C1), rows = wo

    def pool_cols(m, w0):                    # max over wo in [w0, w0+POOL)
        r = m[w0:w0 + 1, :]
        for j in range(1, POOL):
            r = jnp.maximum(r, m[w0 + j:w0 + j + 1, :])
        return r                             # (1, C1)

    # ---- fc1: channel-major flatten folded into the pre-permuted fc1 weight,
    #      applied as a sum of per-(ph, pw) matmuls (no in-kernel relayout) ----
    h1 = b1_ref[...]                         # (1, F1)
    k = 0
    for ph in range(HP):
        rows = pool_rows(ph * POOL)
        for pw in range(WP):
            p = pool_cols(rows, pw * POOL)   # (1, C1)
            h1 = h1 + jnp.dot(p, w1_ref[k * C1:(k + 1) * C1, :],
                              preferred_element_type=f32)
            k += 1

    # ---- gdn2 -> fc2 -----------------------------------------------------------
    d2 = jnp.dot(h1 * h1, g2_ref[...], preferred_element_type=f32) + bt2_ref[...]
    y2 = h1 * jax.lax.rsqrt(d2)              # (1, F1)
    s = jnp.sum(y2 * w2_ref[...], axis=1, keepdims=True) + b2_ref[...]  # (1, 1)
    o_ref[0] = s.astype(o_ref.dtype)


def meon_fused(xsd, wblk, bc, g1, bt1, w1p, b1, g2, bt2, w2r, b2):
    n = xsd.shape[0]

    def full(arr):
        nd = arr.ndim
        return pl.BlockSpec(arr.shape, lambda i, _nd=nd: (0,) * _nd)

    return pl.pallas_call(
        _meon_kernel,
        out_shape=jax.ShapeDtypeStruct((n, 1, 1), DT),
        grid=(n,),
        in_specs=[
            pl.BlockSpec((1, QH * QW, LSD), lambda i: (i, 0, 0)),
            full(wblk), full(bc), full(g1), full(bt1),
            full(w1p), full(b1), full(g2), full(bt2), full(w2r), full(b2),
        ],
        out_specs=pl.BlockSpec((1, 1, 1), lambda i: (i, 0, 0)),
        compiler_params=pltpu.CompilerParams(
            dimension_semantics=("parallel",)),
    )(xsd, wblk, bc, g1, bt1, w1p, b1, g2, bt2, w2r, b2)


# ---------------------------------------------------------------------------
# Parameters (deterministic init mirroring the reference __init__)
# ---------------------------------------------------------------------------
def init_params(key):
    ks = jax.random.split(key, 6)

    def conv_init(k, shape):  # shape = (Cout, Cin, kh, kw); n = kh*kw*Cout (as in ref)
        n = shape[2] * shape[3] * shape[0]
        return (jax.random.normal(k, shape, DT) * math.sqrt(2.0 / n)).astype(DT)

    def bias_init(k, shape, fan_in):
        bound = 1.0 / math.sqrt(fan_in)
        return jax.random.uniform(k, shape, DT, -bound, bound)

    return {
        "conv1_w": conv_init(ks[0], (C1, CIN, KS, KS)),
        "conv1_b": bias_init(ks[1], (C1,), CIN * KS * KS),
        "gamma1": jnp.ones((C1, C1), DT),
        "beta1": jnp.full((C1,), 0.01, DT),
        "fc1_w": conv_init(ks[2], (F1, CF, 1, 1)),
        "fc1_b": bias_init(ks[3], (F1,), CF),
        "gamma2": jnp.ones((F1, F1), DT),
        "beta2": jnp.full((F1,), 0.01, DT),
        "fc2_w": conv_init(ks[4], (1, F1, 1, 1)),
        "fc2_b": bias_init(ks[5], (1,), F1),
    }


# ---------------------------------------------------------------------------
# Forward pass: cheap XLA-side layout prep (pad + one space-to-depth transpose,
# one-time weight permutations) + a single fused Pallas kernel.
# ---------------------------------------------------------------------------
def meon_forward(x, params):
    n = x.shape[0]
    assert n == B, "MeonNoDTWideSize hard-codes batch=25 via MyView((25,-1,1,1))"

    # ---- pad + space-to-depth (no data duplication, one XLA transpose) -------
    # xsd[b, qh*QW+qw, (sh*4+sw)*3+cin] = xpad[b, cin, 4*qh+sh, 4*qw+sw]
    xp = jnp.pad(x, ((0, 0), (0, 0), (PAD, PAD), (PAD, PAD)))
    xsd = xp.reshape(n, CIN, QH, STRIDE, QW, STRIDE)
    xsd = xsd.transpose(0, 2, 4, 3, 5, 1).reshape(n, QH * QW, LSD)

    # ---- conv1 weight -> 4 phase blocks (ah, aw), taps beyond 7x7 zeroed ------
    wc = params["conv1_w"]                                       # (C1, CIN, 7, 7)
    wcp = jnp.pad(wc, ((0, 0), (0, 0),
                       (0, 2 * STRIDE - KS), (0, 2 * STRIDE - KS)))  # (C1,CIN,8,8)
    wcp = wcp.reshape(C1, CIN, 2, STRIDE, 2, STRIDE)             # [c1,cin,ah,sh,aw,sw]
    wblk = wcp.transpose(2, 4, 3, 5, 1, 0).reshape(2, 2, LSD, C1)

    # ---- fc1 weight: permute rows from NCHW-flatten (c,ph,pw) to (ph,pw,c) ----
    w1p = (params["fc1_w"].reshape(F1, C1, HP, WP)
           .transpose(2, 3, 1, 0).reshape(CF, F1))
    w2r = params["fc2_w"].reshape(1, F1)                         # fc2 as a row

    s = meon_fused(
        xsd, wblk,
        params["conv1_b"][None, :],
        params["gamma1"], params["beta1"][None, :],
        w1p, params["fc1_b"][None, :],
        params["gamma2"], params["beta2"][None, :],
        w2r, params["fc2_b"][None, :])                           # (B, 1, 1)

    # view1: (25, -1, 1, 1)
    return s.reshape(n, -1, 1, 1)


if __name__ == "__main__":
    key = jax.random.PRNGKey(0)
    k_in, k_par = jax.random.split(key)
    x = jax.random.normal(k_in, (B, CIN, H, W), DT)
    params = init_params(k_par)

    out = jax.jit(meon_forward)(x, params)
    out = jax.block_until_ready(out)

    assert out.shape == (B, 1, 1, 1), out.shape
    assert bool(jnp.all(jnp.isfinite(out)))
    print("KERNEL_OK")
</pallas_src>

<mosaic_0001>
module attributes {stable_mosaic.version = 11 : i64} {
  func.func @_meon_kernel(%arg0: i32, %arg1: memref<1x169x48xf32, #tpu.memory_space<vmem>>, %arg2: memref<2x2x48x32xf32, #tpu.memory_space<vmem>>, %arg3: memref<1x32xf32, #tpu.memory_space<vmem>>, %arg4: memref<32x32xf32, #tpu.memory_space<vmem>>, %arg5: memref<1x32xf32, #tpu.memory_space<vmem>>, %arg6: memref<128x128xf32, #tpu.memory_space<vmem>>, %arg7: memref<1x128xf32, #tpu.memory_space<vmem>>, %arg8: memref<128x128xf32, #tpu.memory_space<vmem>>, %arg9: memref<1x128xf32, #tpu.memory_space<vmem>>, %arg10: memref<1x128xf32, #tpu.memory_space<vmem>>, %arg11: memref<1x1xf32, #tpu.memory_space<vmem>>, %arg12: memref<1x1x1xf32, #tpu.memory_space<vmem>>) attributes {dimension_semantics = [#tpu.dimension_semantics<parallel>], iteration_bounds = array<i64: 25>, scalar_prefetch = 0 : i64, scratch_operands = 0 : i64, tpu.core_type = #tpu.core_type<tc>, window_params = [{transform_indices = @transform_0, window_bounds = array<i64: 1, 169, 48>}, {pipeline_mode = #tpu.pipeline_mode<synchronous>, transform_indices = @transform_1, window_bounds = array<i64: 2, 2, 48, 32>}, {pipeline_mode = #tpu.pipeline_mode<synchronous>, transform_indices = @transform_2, window_bounds = array<i64: 1, 32>}, {pipeline_mode = #tpu.pipeline_mode<synchronous>, transform_indices = @transform_3, window_bounds = array<i64: 32, 32>}, {pipeline_mode = #tpu.pipeline_mode<synchronous>, transform_indices = @transform_4, window_bounds = array<i64: 1, 32>}, {pipeline_mode = #tpu.pipeline_mode<synchronous>, transform_indices = @transform_5, window_bounds = array<i64: 128, 128>}, {pipeline_mode = #tpu.pipeline_mode<synchronous>, transform_indices = @transform_6, window_bounds = array<i64: 1, 128>}, {pipeline_mode = #tpu.pipeline_mode<synchronous>, transform_indices = @transform_7, window_bounds = array<i64: 128, 128>}, {pipeline_mode = #tpu.pipeline_mode<synchronous>, transform_indices = @transform_8, window_bounds = array<i64: 1, 128>}, {pipeline_mode = #tpu.pipeline_mode<synchronous>, transform_indices = @transform_9, window_bounds = array<i64: 1, 128>}, {pipeline_mode = #tpu.pipeline_mode<synchronous>, transform_indices = @transform_10, window_bounds = array<i64: 1, 1>}, {transform_indices = @transform_11, window_bounds = array<i64: 1, 1, 1>}]} {
    %c0 = arith.constant 0 : index
    %c0_0 = arith.constant 0 : index
    %c0_1 = arith.constant 0 : index
    %0 = vector.load %arg1[%c0, %c0_0, %c0_1] : memref<1x169x48xf32, #tpu.memory_space<vmem>>, vector<1x155x48xf32>
    %1 = vector.shape_cast %0 : vector<1x155x48xf32> to vector<155x48xf32>
    %c0_2 = arith.constant 0 : index
    %c0_3 = arith.constant 0 : index
    %c0_4 = arith.constant 0 : index
    %c0_5 = arith.constant 0 : index
    %2 = vector.load %arg2[%c0_2, %c0_3, %c0_4, %c0_5] : memref<2x2x48x32xf32, #tpu.memory_space<vmem>>, vector<1x1x48x32xf32>
    %3 = vector.shape_cast %2 : vector<1x1x48x32xf32> to vector<48x32xf32>
    %cst = arith.constant dense<0.000000e+00> : vector<155x32xf32>
    %4 = tpu.matmul %1, %3, %cst {dimension_numbers = #tpu.dot_dimension_numbers<[1], [0], [0], [1], [0, 0, 1, 1], [], []>} : vector<155x48xf32>, vector<48x32xf32>, vector<155x32xf32> -> vector<155x32xf32>
    %c0_6 = arith.constant 0 : index
    %c1 = arith.constant 1 : index
    %c0_7 = arith.constant 0 : index
    %5 = vector.load %arg1[%c0_6, %c1, %c0_7] : memref<1x169x48xf32, #tpu.memory_space<vmem>>, vector<1x155x48xf32>
    %6 = vector.shape_cast %5 : vector<1x155x48xf32> to vector<155x48xf32>
    %c0_8 = arith.constant 0 : index
    %c1_9 = arith.constant 1 : index
    %c0_10 = arith.constant 0 : index
    %c0_11 = arith.constant 0 : index
    %7 = vector.load %arg2[%c0_8, %c1_9, %c0_10, %c0_11] : memref<2x2x48x32xf32, #tpu.memory_space<vmem>>, vector<1x1x48x32xf32>
    %8 = vector.shape_cast %7 : vector<1x1x48x32xf32> to vector<48x32xf32>
    %cst_12 = arith.constant dense<0.000000e+00> : vector<155x32xf32>
    %9 = tpu.matmul %6, %8, %cst_12 {dimension_numbers = #tpu.dot_dimension_numbers<[1], [0], [0], [1], [0, 0, 1, 1], [], []>} : vector<155x48xf32>, vector<48x32xf32>, vector<155x32xf32> -> vector<155x32xf32>
    %10 = arith.addf %4, %9 : vector<155x32xf32>
    %c0_13 = arith.constant 0 : index
    %c13 = arith.constant 13 : index
    %c0_14 = arith.constant 0 : index
    %11 = vector.load %arg1[%c0_13, %c13, %c0_14] : memref<1x169x48xf32, #tpu.memory_space<vmem>>, vector<1x155x48xf32>
    %12 = vector.shape_cast %11 : vector<1x155x48xf32> to vector<155x48xf32>
    %c1_15 = arith.constant 1 : index
    %c0_16 = arith.constant 0 : index
    %c0_17 = arith.constant 0 : index
    %c0_18 = arith.constant 0 : index
    %13 = vector.load %arg2[%c1_15, %c0_16, %c0_17, %c0_18] : memref<2x2x48x32xf32, #tpu.memory_space<vmem>>, vector<1x1x48x32xf32>
    %14 = vector.shape_cast %13 : vector<1x1x48x32xf32> to vector<48x32xf32>
    %cst_19 = arith.constant dense<0.000000e+00> : vector<155x32xf32>
    %15 = tpu.matmul %12, %14, %cst_19 {dimension_numbers = #tpu.dot_dimension_numbers<[1], [0], [0], [1], [0, 0, 1, 1], [], []>} : vector<155x48xf32>, vector<48x32xf32>, vector<155x32xf32> -> vector<155x32xf32>
    %16 = arith.addf %10, %15 : vector<155x32xf32>
    %c0_20 = arith.constant 0 : index
    %c14 = arith.constant 14 : index
    %c0_21 = arith.constant 0 : index
    %17 = vector.load %arg1[%c0_20, %c14, %c0_21] : memref<1x169x48xf32, #tpu.memory_space<vmem>>, vector<1x155x48xf32>
    %18 = vector.shape_cast %17 : vector<1x155x48xf32> to vector<155x48xf32>
    %c1_22 = arith.constant 1 : index
    %c1_23 = arith.constant 1 : index
    %c0_24 = arith.constant 0 : index
    %c0_25 = arith.constant 0 : index
    %19 = vector.load %arg2[%c1_22, %c1_23, %c0_24, %c0_25] : memref<2x2x48x32xf32, #tpu.memory_space<vmem>>, vector<1x1x48x32xf32>
    %20 = vector.shape_cast %19 : vector<1x1x48x32xf32> to vector<48x32xf32>
    %cst_26 = arith.constant dense<0.000000e+00> : vector<155x32xf32>
    %21 = tpu.matmul %18, %20, %cst_26 {dimension_numbers = #tpu.dot_dimension_numbers<[1], [0], [0], [1], [0, 0, 1, 1], [], []>} : vector<155x48xf32>, vector<48x32xf32>, vector<155x32xf32> -> vector<155x32xf32>
    %22 = arith.addf %16, %21 : vector<155x32xf32>
    %c0_27 = arith.constant 0 : index
    %c0_28 = arith.constant 0 : index
    %23 = vector.load %arg3[%c0_27, %c0_28] : memref<1x32xf32, #tpu.memory_space<vmem>>, vector<1x32xf32>
    %24 = vector.broadcast %23 : vector<1x32xf32> to vector<155x32xf32>
    %25 = arith.addf %22, %24 : vector<155x32xf32>
    %26 = arith.mulf %25, %25 : vector<155x32xf32>
    %c0_29 = arith.constant 0 : index
    %c0_30 = arith.constant 0 : index
    %27 = vector.load %arg4[%c0_29, %c0_30] : memref<32x32xf32, #tpu.memory_space<vmem>>, vector<32x32xf32>
    %cst_31 = arith.constant dense<0.000000e+00> : vector<155x32xf32>
    %28 = tpu.matmul %26, %27, %cst_31 {dimension_numbers = #tpu.dot_dimension_numbers<[1], [0], [0], [1], [0, 0, 1, 1], [], []>} : vector<155x32xf32>, vector<32x32xf32>, vector<155x32xf32> -> vector<155x32xf32>
    %c0_32 = arith.constant 0 : index
    %c0_33 = arith.constant 0 : index
    %29 = vector.load %arg5[%c0_32, %c0_33] : memref<1x32xf32, #tpu.memory_space<vmem>>, vector<1x32xf32>
    %30 = vector.broadcast %29 : vector<1x32xf32> to vector<155x32xf32>
    %31 = arith.addf %28, %30 : vector<155x32xf32>
    %32 = math.rsqrt %31 : vector<155x32xf32>
    %33 = arith.mulf %25, %32 : vector<155x32xf32>
    %c0_34 = arith.constant 0 : index
    %c0_35 = arith.constant 0 : index
    %34 = vector.load %arg7[%c0_34, %c0_35] : memref<1x128xf32, #tpu.memory_space<vmem>>, vector<1x128xf32>
    %35 = vector.extract_strided_slice %33 {offsets = [0, 0], sizes = [12, 32], strides = [1, 1]} : vector<155x32xf32> to vector<12x32xf32>
    %36 = vector.extract_strided_slice %33 {offsets = [13, 0], sizes = [12, 32], strides = [1, 1]} : vector<155x32xf32> to vector<12x32xf32>
    %37 = arith.maximumf %35, %36 : vector<12x32xf32>
    %38 = vector.extract_strided_slice %33 {offsets = [26, 0], sizes = [12, 32], strides = [1, 1]} : vector<155x32xf32> to vector<12x32xf32>
    %39 = arith.maximumf %37, %38 : vector<12x32xf32>
    %40 = vector.extract_strided_slice %33 {offsets = [39, 0], sizes = [12, 32], strides = [1, 1]} : vector<155x32xf32> to vector<12x32xf32>
    %41 = arith.maximumf %39, %40 : vector<12x32xf32>
    %42 = vector.extract_strided_slice %33 {offsets = [52, 0], sizes = [12, 32], strides = [1, 1]} : vector<155x32xf32> to vector<12x32xf32>
    %43 = arith.maximumf %41, %42 : vector<12x32xf32>
    %44 = vector.extract_strided_slice %33 {offsets = [65, 0], sizes = [12, 32], strides = [1, 1]} : vector<155x32xf32> to vector<12x32xf32>
    %45 = arith.maximumf %43, %44 : vector<12x32xf32>
    %46 = vector.extract_strided_slice %45 {offsets = [0, 0], sizes = [1, 32], strides = [1, 1]} : vector<12x32xf32> to vector<1x32xf32>
    %47 = vector.extract_strided_slice %45 {offsets = [1, 0], sizes = [1, 32], strides = [1, 1]} : vector<12x32xf32> to vector<1x32xf32>
    %48 = arith.maximumf %46, %47 : vector<1x32xf32>
    %49 = vector.extract_strided_slice %45 {offsets = [2, 0], sizes = [1, 32], strides = [1, 1]} : vector<12x32xf32> to vector<1x32xf32>
    %50 = arith.maximumf %48, %49 : vector<1x32xf32>
    %51 = vector.extract_strided_slice %45 {offsets = [3, 0], sizes = [1, 32], strides = [1, 1]} : vector<12x32xf32> to vector<1x32xf32>
    %52 = arith.maximumf %50, %51 : vector<1x32xf32>
    %53 = vector.extract_strided_slice %45 {offsets = [4, 0], sizes = [1, 32], strides = [1, 1]} : vector<12x32xf32> to vector<1x32xf32>
    %54 = arith.maximumf %52, %53 : vector<1x32xf32>
    %55 = vector.extract_strided_slice %45 {offsets = [5, 0], sizes = [1, 32], strides = [1, 1]} : vector<12x32xf32> to vector<1x32xf32>
    %56 = arith.maximumf %54, %55 : vector<1x32xf32>
    %c0_36 = arith.constant 0 : index
    %c0_37 = arith.constant 0 : index
    %57 = vector.load %arg6[%c0_36, %c0_37] : memref<128x128xf32, #tpu.memory_space<vmem>>, vector<32x128xf32>
    %cst_38 = arith.constant dense<0.000000e+00> : vector<1x128xf32>
    %58 = tpu.matmul %56, %57, %cst_38 {dimension_numbers = #tpu.dot_dimension_numbers<[1], [0], [0], [1], [0, 0, 1, 1], [], []>} : vector<1x32xf32>, vector<32x128xf32>, vector<1x128xf32> -> vector<1x128xf32>
    %59 = arith.addf %34, %58 : vector<1x128xf32>
    %60 = vector.extract_strided_slice %45 {offsets = [6, 0], sizes = [1, 32], strides = [1, 1]} : vector<12x32xf32> to vector<1x32xf32>
    %61 = vector.extract_strided_slice %45 {offsets = [7, 0], sizes = [1, 32], strides = [1, 1]} : vector<12x32xf32> to vector<1x32xf32>
    %62 = arith.maximumf %60, %61 : vector<1x32xf32>
    %63 = vector.extract_strided_slice %45 {offsets = [8, 0], sizes = [1, 32], strides = [1, 1]} : vector<12x32xf32> to vector<1x32xf32>
    %64 = arith.maximumf %62, %63 : vector<1x32xf32>
    %65 = vector.extract_strided_slice %45 {offsets = [9, 0], sizes = [1, 32], strides = [1, 1]} : vector<12x32xf32> to vector<1x32xf32>
    %66 = arith.maximumf %64, %65 : vector<1x32xf32>
    %67 = vector.extract_strided_slice %45 {offsets = [10, 0], sizes = [1, 32], strides = [1, 1]} : vector<12x32xf32> to vector<1x32xf32>
    %68 = arith.maximumf %66, %67 : vector<1x32xf32>
    %69 = vector.extract_strided_slice %45 {offsets = [11, 0], sizes = [1, 32], strides = [1, 1]} : vector<12x32xf32> to vector<1x32xf32>
    %70 = arith.maximumf %68, %69 : vector<1x32xf32>
    %c32 = arith.constant 32 : index
    %c0_39 = arith.constant 0 : index
    %71 = vector.load %arg6[%c32, %c0_39] : memref<128x128xf32, #tpu.memory_space<vmem>>, vector<32x128xf32>
    %cst_40 = arith.constant dense<0.000000e+00> : vector<1x128xf32>
    %72 = tpu.matmul %70, %71, %cst_40 {dimension_numbers = #tpu.dot_dimension_numbers<[1], [0], [0], [1], [0, 0, 1, 1], [], []>} : vector<1x32xf32>, vector<32x128xf32>, vector<1x128xf32> -> vector<1x128xf32>
    %73 = arith.addf %59, %72 : vector<1x128xf32>
    %74 = vector.extract_strided_slice %33 {offsets = [78, 0], sizes = [12, 32], strides = [1, 1]} : vector<155x32xf32> to vector<12x32xf32>
    %75 = vector.extract_strided_slice %33 {offsets = [91, 0], sizes = [12, 32], strides = [1, 1]} : vector<155x32xf32> to vector<12x32xf32>
    %76 = arith.maximumf %74, %75 : vector<12x32xf32>
    %77 = vector.extract_strided_slice %33 {offsets = [104, 0], sizes = [12, 32], strides = [1, 1]} : vector<155x32xf32> to vector<12x32xf32>
    %78 = arith.maximumf %76, %77 : vector<12x32xf32>
    %79 = vector.extract_strided_slice %33 {offsets = [117, 0], sizes = [12, 32], strides = [1, 1]} : vector<155x32xf32> to vector<12x32xf32>
    %80 = arith.maximumf %78, %79 : vector<12x32xf32>
    %81 = vector.extract_strided_slice %33 {offsets = [130, 0], sizes = [12, 32], strides = [1, 1]} : vector<155x32xf32> to vector<12x32xf32>
    %82 = arith.maximumf %80, %81 : vector<12x32xf32>
    %83 = vector.extract_strided_slice %33 {offsets = [143, 0], sizes = [12, 32], strides = [1, 1]} : vector<155x32xf32> to vector<12x32xf32>
    %84 = arith.maximumf %82, %83 : vector<12x32xf32>
    %85 = vector.extract_strided_slice %84 {offsets = [0, 0], sizes = [1, 32], strides = [1, 1]} : vector<12x32xf32> to vector<1x32xf32>
    %86 = vector.extract_strided_slice %84 {offsets = [1, 0], sizes = [1, 32], strides = [1, 1]} : vector<12x32xf32> to vector<1x32xf32>
    %87 = arith.maximumf %85, %86 : vector<1x32xf32>
    %88 = vector.extract_strided_slice %84 {offsets = [2, 0], sizes = [1, 32], strides = [1, 1]} : vector<12x32xf32> to vector<1x32xf32>
    %89 = arith.maximumf %87, %88 : vector<1x32xf32>
    %90 = vector.extract_strided_slice %84 {offsets = [3, 0], sizes = [1, 32], strides = [1, 1]} : vector<12x32xf32> to vector<1x32xf32>
    %91 = arith.maximumf %89, %90 : vector<1x32xf32>
    %92 = vector.extract_strided_slice %84 {offsets = [4, 0], sizes = [1, 32], strides = [1, 1]} : vector<12x32xf32> to vector<1x32xf32>
    %93 = arith.maximumf %91, %92 : vector<1x32xf32>
    %94 = vector.extract_strided_slice %84 {offsets = [5, 0], sizes = [1, 32], strides = [1, 1]} : vector<12x32xf32> to vector<1x32xf32>
    %95 = arith.maximumf %93, %94 : vector<1x32xf32>
    %c64 = arith.constant 64 : index
    %c0_41 = arith.constant 0 : index
    %96 = vector.load %arg6[%c64, %c0_41] : memref<128x128xf32, #tpu.memory_space<vmem>>, vector<32x128xf32>
    %cst_42 = arith.constant dense<0.000000e+00> : vector<1x128xf32>
    %97 = tpu.matmul %95, %96, %cst_42 {dimension_numbers = #tpu.dot_dimension_numbers<[1], [0], [0], [1], [0, 0, 1, 1], [], []>} : vector<1x32xf32>, vector<32x128xf32>, vector<1x128xf32> -> vector<1x128xf32>
    %98 = arith.addf %73, %97 : vector<1x128xf32>
    %99 = vector.extract_strided_slice %84 {offsets = [6, 0], sizes = [1, 32], strides = [1, 1]} : vector<12x32xf32> to vector<1x32xf32>
    %100 = vector.extract_strided_slice %84 {offsets = [7, 0], sizes = [1, 32], strides = [1, 1]} : vector<12x32xf32> to vector<1x32xf32>
    %101 = arith.maximumf %99, %100 : vector<1x32xf32>
    %102 = vector.extract_strided_slice %84 {offsets = [8, 0], sizes = [1, 32], strides = [1, 1]} : vector<12x32xf32> to vector<1x32xf32>
    %103 = arith.maximumf %101, %102 : vector<1x32xf32>
    %104 = vector.extract_strided_slice %84 {offsets = [9, 0], sizes = [1, 32], strides = [1, 1]} : vector<12x32xf32> to vector<1x32xf32>
    %105 = arith.maximumf %103, %104 : vector<1x32xf32>
    %106 = vector.extract_strided_slice %84 {offsets = [10, 0], sizes = [1, 32], strides = [1, 1]} : vector<12x32xf32> to vector<1x32xf32>
    %107 = arith.maximumf %105, %106 : vector<1x32xf32>
    %108 = vector.extract_strided_slice %84 {offsets = [11, 0], sizes = [1, 32], strides = [1, 1]} : vector<12x32xf32> to vector<1x32xf32>
    %109 = arith.maximumf %107, %108 : vector<1x32xf32>
    %c96 = arith.constant 96 : index
    %c0_43 = arith.constant 0 : index
    %110 = vector.load %arg6[%c96, %c0_43] : memref<128x128xf32, #tpu.memory_space<vmem>>, vector<32x128xf32>
    %cst_44 = arith.constant dense<0.000000e+00> : vector<1x128xf32>
    %111 = tpu.matmul %109, %110, %cst_44 {dimension_numbers = #tpu.dot_dimension_numbers<[1], [0], [0], [1], [0, 0, 1, 1], [], []>} : vector<1x32xf32>, vector<32x128xf32>, vector<1x128xf32> -> vector<1x128xf32>
    %112 = arith.addf %98, %111 : vector<1x128xf32>
    %113 = arith.mulf %112, %112 : vector<1x128xf32>
    %c0_45 = arith.constant 0 : index
    %c0_46 = arith.constant 0 : index
    %114 = vector.load %arg8[%c0_45, %c0_46] : memref<128x128xf32, #tpu.memory_space<vmem>>, vector<128x128xf32>
    %cst_47 = arith.constant dense<0.000000e+00> : vector<1x128xf32>
    %115 = tpu.matmul %113, %114, %cst_47 {dimension_numbers = #tpu.dot_dimension_numbers<[1], [0], [0], [1], [0, 0, 1, 1], [], []>} : vector<1x128xf32>, vector<128x128xf32>, vector<1x128xf32> -> vector<1x128xf32>
    %c0_48 = arith.constant 0 : index
    %c0_49 = arith.constant 0 : index
    %116 = vector.load %arg9[%c0_48, %c0_49] : memref<1x128xf32, #tpu.memory_space<vmem>>, vector<1x128xf32>
    %117 = arith.addf %115, %116 : vector<1x128xf32>
    %118 = math.rsqrt %117 : vector<1x128xf32>
    %119 = arith.mulf %112, %118 : vector<1x128xf32>
    %c0_50 = arith.constant 0 : index
    %c0_51 = arith.constant 0 : index
    %120 = vector.load %arg10[%c0_50, %c0_51] : memref<1x128xf32, #tpu.memory_space<vmem>>, vector<1x128xf32>
    %121 = arith.mulf %119, %120 : vector<1x128xf32>
    %cst_52 = arith.constant dense<0.000000e+00> : vector<1xf32>
    %122 = vector.multi_reduction <add>, %121, %cst_52 [1] : vector<1x128xf32> to vector<1xf32>
    %123 = vector.shape_cast %122 : vector<1xf32> to vector<1x1xf32>
    %c0_53 = arith.constant 0 : index
    %c0_54 = arith.constant 0 : index
    %124 = vector.load %arg11[%c0_53, %c0_54] : memref<1x1xf32, #tpu.memory_space<vmem>>, vector<1x1xf32>
    %125 = arith.addf %123, %124 : vector<1x1xf32>
    %c0_55 = arith.constant 0 : index
    %c0_56 = arith.constant 0 : index
    %c0_57 = arith.constant 0 : index
    %126 = vector.load %arg12[%c0_55, %c0_56, %c0_57] : memref<1x1x1xf32, #tpu.memory_space<vmem>>, vector<1x1x1xf32>
    %127 = vector.shape_cast %126 : vector<1x1x1xf32> to vector<1x1xf32>
    %128 = vector.shape_cast %125 : vector<1x1xf32> to vector<1x1x1xf32>
    tpu.vector_store %arg12[%c0_55, %c0_56, %c0_57], %128 {strides = array<i32>} : memref<1x1x1xf32, #tpu.memory_space<vmem>>, vector<1x1x1xf32>,
    return
  }
  func.func @transform_0(%arg0: i32) -> (i32, i32, i32) {
    %c0_i32 = arith.constant 0 : i32
    %c0_i32_0 = arith.constant 0 : i32
    %c0_i32_1 = arith.constant 0 : i32
    return %arg0, %c0_i32, %c0_i32_0 : i32, i32, i32
  }
  func.func @transform_1(%arg0: i32) -> (i32, i32, i32, i32) {
    %c0_i32 = arith.constant 0 : i32
    %c0_i32_0 = arith.constant 0 : i32
    %c0_i32_1 = arith.constant 0 : i32
    %c0_i32_2 = arith.constant 0 : i32
    %c0_i32_3 = arith.constant 0 : i32
    return %c0_i32, %c0_i32_0, %c0_i32_1, %c0_i32_2 : i32, i32, i32, i32
  }
  func.func @transform_2(%arg0: i32) -> (i32, i32) {
    %c0_i32 = arith.constant 0 : i32
    %c0_i32_0 = arith.constant 0 : i32
    %c0_i32_1 = arith.constant 0 : i32
    return %c0_i32, %c0_i32_0 : i32, i32
  }
  func.func @transform_3(%arg0: i32) -> (i32, i32) {
    %c0_i32 = arith.constant 0 : i32
    %c0_i32_0 = arith.constant 0 : i32
    %c0_i32_1 = arith.constant 0 : i32
    return %c0_i32, %c0_i32_0 : i32, i32
  }
  func.func @transform_4(%arg0: i32) -> (i32, i32) {
    %c0_i32 = arith.constant 0 : i32
    %c0_i32_0 = arith.constant 0 : i32
    %c0_i32_1 = arith.constant 0 : i32
    return %c0_i32, %c0_i32_0 : i32, i32
  }
  func.func @transform_5(%arg0: i32) -> (i32, i32) {
    %c0_i32 = arith.constant 0 : i32
    %c0_i32_0 = arith.constant 0 : i32
    %c0_i32_1 = arith.constant 0 : i32
    return %c0_i32, %c0_i32_0 : i32, i32
  }
  func.func @transform_6(%arg0: i32) -> (i32, i32) {
    %c0_i32 = arith.constant 0 : i32
    %c0_i32_0 = arith.constant 0 : i32
    %c0_i32_1 = arith.constant 0 : i32
    return %c0_i32, %c0_i32_0 : i32, i32
  }
  func.func @transform_7(%arg0: i32) -> (i32, i32) {
    %c0_i32 = arith.constant 0 : i32
    %c0_i32_0 = arith.constant 0 : i32
    %c0_i32_1 = arith.constant 0 : i32
    return %c0_i32, %c0_i32_0 : i32, i32
  }
  func.func @transform_8(%arg0: i32) -> (i32, i32) {
    %c0_i32 = arith.constant 0 : i32
    %c0_i32_0 = arith.constant 0 : i32
    %c0_i32_1 = arith.constant 0 : i32
    return %c0_i32, %c0_i32_0 : i32, i32
  }
  func.func @transform_9(%arg0: i32) -> (i32, i32) {
    %c0_i32 = arith.constant 0 : i32
    %c0_i32_0 = arith.constant 0 : i32
    %c0_i32_1 = arith.constant 0 : i32
    return %c0_i32, %c0_i32_0 : i32, i32
  }
  func.func @transform_10(%arg0: i32) -> (i32, i32) {
    %c0_i32 = arith.constant 0 : i32
    %c0_i32_0 = arith.constant 0 : i32
    %c0_i32_1 = arith.constant 0 : i32
    return %c0_i32, %c0_i32_0 : i32, i32
  }
  func.func @transform_11(%arg0: i32) -> (i32, i32, i32) {
    %c0_i32 = arith.constant 0 : i32
    %c0_i32_0 = arith.constant 0 : i32
    %c0_i32_1 = arith.constant 0 : i32
    return %arg0, %c0_i32, %c0_i32_0 : i32, i32, i32
  }
}

</mosaic_0001>

<bundles_post_ra>
// kernel: meon_forward.1
= control target key start
LH: loop header
LB: loop body
LE: loop exit
PB: predicated region body
PF: predicated region fallthrough
CT: control target
= control target key end

     0   :  { %s3275_s19 = smov 0   ;;  %s3893_s0 = inlined_call_operand.vmem [shape: f32[25,169,48], index: 0, kind: input, shape index: {}]   ;;  %s3894_s1 = inlined_call_operand.vmem [shape: f32[2,2,48,32], index: 1, kind: input, shape index: {}]   ;;  %s3895_s2 = inlined_call_operand.vmem [shape: f32[1,32], index: 2, kind: input, shape index: {}]   ;;  %s3896_s3 = inlined_call_operand.vmem [shape: f32[32,32], index: 3, kind: input, shape index: {}]   ;;  %s3897_s4 = inlined_call_operand.vmem [shape: f32[1,32], index: 4, kind: input, shape index: {}]   ;;  %s3898_s5 = inlined_call_operand.vmem [shape: f32[128,128], index: 5, kind: input, shape index: {}]   ;;  %s3899_s6 = inlined_call_operand.vmem [shape: f32[1,128], index: 6, kind: input, shape index: {}]   ;;  %s3900_s7 = inlined_call_operand.vmem [shape: f32[128,128], index: 7, kind: input, shape index: {}]   ;;  %s3901_s8 = inlined_call_operand.vmem [shape: f32[1,128], index: 8, kind: input, shape index: {}]   ;;  %s3902_s9 = inlined_call_operand.vmem [shape: f32[1,128], index: 9, kind: input, shape index: {}]   ;;  %s3903_s10 = inlined_call_operand.<no memory space> [shape: f32[1,1], index: 10, kind: input, shape index: {}]   ;;  %s3904_s11 = inlined_call_operand.vmem [shape: f32[25,1,1], index: 11, kind: output, shape index: {}]  }
   0x1   :  { %v16_v0 = vstv %s3903_s10 }
   0x2   :  { %17 = vst [vmem:[#allocation2] sm:$0x1] %v16_v0 }
   0x3 LB: > { %s2388_s20 = sadd.s32 4294967295, %s3207_s19   ;;  %p2392_p0 = scmp.ge.s32.totalorder %s3207_s19, 1  ;;  %s3207_s19 = sphi %s3275_s19, %s23_s19  }
   0x4   : > { %p339_p1 = scmp.lt.s32.totalorder %s3207_s19, 26 }
   0x6   : > { %p340_p2 = pnand %p2392_p0, %p339_p1 }
   0x7   : > { %v2394_v1 = vld [vmem:[%s3894_s1 + $0x30] sm:$0xff] (!%p340_p2)  ;;  %v2395_v2 = vld [vmem:[%s3894_s1 + $0x38] sm:$0xff] (!%p340_p2)  ;;  %v2396_v3 = vld [vmem:[%s3894_s1 + $0x40] sm:$0xff] (!%p340_p2)  ;;  %p377_p3 = scmp.lt.s32.totalorder (!%p340_p2), %s2388_s20, 24  ;;  %vm438_vm0 = vcmask (!%p340_p2), 392192   ;;  %vm1491_vm1 = vcmask (!%p340_p2), 261120  }
   0x8   : > { %343 = sbr.rel (%p340_p2) target bundleno = 1216 (0x4c0), region = 64  ;;  %v2970_v4 = vpack.c.bf16 (!%p340_p2), %v2395_v2, %v2394_v1  ;;  %v2397_v5 = vld [vmem:[%s3894_s1 + $0x48] sm:$0xff] (!%p340_p2)  ;;  %v2398_v7 = vld [vmem:[%s3894_s1 + $0x50] sm:$0xff] (!%p340_p2)  ;;  %v2399_v8 = vld [vmem:[%s3894_s1 + $0x58] sm:$0xff] (!%p340_p2)  ;;  %vm3210_vm2 = vmmov (!%p340_p2), 0   ;;  %vm1761_vm3 = vcmask (!%p340_p2), 1042432  }
   0x9   : > { %v2974_v6 = vpack.c.bf16 (!%p340_p2), %v2397_v5, %v2396_v3  ;;  %v2978_v9 = vpack.c.bf16 (!%p340_p2), %v2399_v8, %v2398_v7  ;;  %v405_v10 = vld [vmem:[%s3894_s1] sm:$0xff] (!%p340_p2)  ;;  %v406_v11 = vld [vmem:[%s3894_s1 + $0x8] sm:$0xff] (!%p340_p2)  ;;  %v407_v14 = vld [vmem:[%s3894_s1 + $0x10] sm:$0xff] (!%p340_p2)  ;;  %vm1772_vm4 = vcmask (!%p340_p2), 1045504   ;;  %vm1782_vm5 = vcmask (!%p340_p2), 1040384  }
   0xa   : > { %2971 = vmatprep.subr.bf16.mxu0 (!%p340_p2), %v2970_v4  ;;  %3074 = vmatprep.subr.bf16.mxu1 (!%p340_p2), %v2970_v4  ;;  %v2982_v13 = vpack.c.bf16 (!%p340_p2), %v406_v11, %v405_v10  ;;  %v408_v15 = vld [vmem:[%s3894_s1 + $0x18] sm:$0xff] (!%p340_p2)  ;;  %v409_v19 = vld [vmem:[%s3894_s1 + $0x20] sm:$0xff] (!%p340_p2)  ;;  %v410_v20 = vld [vmem:[%s3894_s1 + $0x28] sm:$0xff] (!%p340_p2)  ;;  %vm1793_vm6 = vcmask (!%p340_p2), 1043456   ;;  %vm1803_vm7 = vcmask (!%p340_p2), 1046528   ;;  %vm2339_vm8 = vcmask (!%p340_p2), 0  }
   0xb   : > { %2973 = vmatpush3.bf16.msra.mxu0 (!%p340_p2), %v2970_v4  ;;  %3077 = vmatpush3.bf16.msra.mxu1 (!%p340_p2), %v2970_v4  ;;  %v2986_v18 = vpack.c.bf16 (!%p340_p2), %v408_v15, %v407_v14  ;;  %v2990_v23 = vpack.c.bf16 (!%p340_p2), %v410_v20, %v409_v19  ;;  %v2440_v24 = vld [vmem:[%s3894_s1 + $0x60] sm:$0xff] (!%p340_p2)  ;;  %v2441_v25 = vld [vmem:[%s3894_s1 + $0x68] sm:$0xff] (!%p340_p2)  ;;  %v2442_v29 = vld [vmem:[%s3894_s1 + $0x70] sm:$0xff] (!%p340_p2) }
   0xc   : > { %2975 = vmatprep.subr.bf16.mxu0 (!%p340_p2), %v2974_v6  ;;  %3075 = vmatprep.subr.bf16.mxu1 (!%p340_p2), %v2974_v6  ;;  %v2994_v28 = vpack.c.bf16 (!%p340_p2), %v2441_v25, %v2440_v24  ;;  %v2443_v30 = vld [vmem:[%s3894_s1 + $0x78] sm:$0xff] (!%p340_p2)  ;;  %v2444_v34 = vld [vmem:[%s3894_s1 + $0x80] sm:$0xff] (!%p340_p2)  ;;  %v2445_v36 = vld [vmem:[%s3894_s1 + $0x88] sm:$0xff] (!%p340_p2) }
   0xd   : > { %v2998_v33 = vpack.c.bf16 (!%p340_p2), %v2443_v30, %v2442_v29  ;;  %v3002_v42 = vpack.c.bf16 (!%p340_p2), %v2445_v36, %v2444_v34  ;;  %v2466_v43 = vld [vmem:[%s3894_s1 + $0x90] sm:$0xff] (!%p340_p2)  ;;  %v2467_v44 = vld [vmem:[%s3894_s1 + $0x98] sm:$0xff] (!%p340_p2)  ;;  %v1480_v51 = vld [vmem:[%s3896_s3] sm:$0xff] (!%p340_p2) }
   0xe   : > { %v3385_v49 = vpack.c.bf16 (!%p340_p2), %v2467_v44, %v2466_v43  ;;  %v1481_v52 = vld [vmem:[%s3896_s3 + $0x8] sm:$0xff] (!%p340_p2)  ;;  %v1482_v53 = vld [vmem:[%s3896_s3 + $0x10] sm:$0xff] (!%p340_p2)  ;;  %v1483_v54 = vld [vmem:[%s3896_s3 + $0x18] sm:$0xff] (!%p340_p2) }
   0xf   : > { %s3906_s20 = smov (!%p377_p3, %s2388_s20), 24  ;;  %2977 = vmatpush3.bf16.msra.mxu0 %v2974_v6  ;;  %3078 = vmatpush3.bf16.msra.mxu1 %v2974_v6  ;;  %v3018_v57 = vpack.c.bf16 %v1481_v52, %v1480_v51  ;;  %v3022_v60 = vpack.c.bf16 %v1483_v54, %v1482_v53  ;;  %v2468_v14 = vld [vmem:[%s3894_s1 + $0xa0] sm:$0xff]  ;;  %v2469_v15 = vld [vmem:[%s3894_s1 + $0xa8] sm:$0xff]  ;;  %v2470_v19 = vld [vmem:[%s3894_s1 + $0xb0] sm:$0xff] }
  0x10   : > { %s3147_s13 = smul.u32 176, %s3906_s20  ;;  %2979 = vmatprep.subr.bf16.mxu0 %v2978_v9  ;;  %3076 = vmatprep.subr.bf16.mxu1 %v2978_v9  ;;  %v2471_v20 = vld [vmem:[%s3894_s1 + $0xb8] sm:$0xff]  ;;  %s384_s12 = scalar_lea.vmem %s3904_s11, %s3906_s20 }
  0x12   : > { %s3307_s16 = scalar_lea.vmem %s3893_s0, %s3147_s13 }
  0x13   : > { %v411_v12 = vld [vmem:[%s3307_s16 + $0x1] sm:$0xff]  ;;  %2981 = vmatpush3.bf16.msra.mxu0 %v2978_v9  ;;  %v412_v16 = vld [vmem:[%s3307_s16 + $0x9] sm:$0xff]  ;;  %v413_v17 = vld [vmem:[%s3307_s16 + $0x11] sm:$0xff]  ;;  %3079 = vmatpush3.bf16.msra.mxu1 %v2978_v9 }
  0x14   : > { %2697 = vmatprep.mubr.msk.f32.mxu0 %vm438_vm0, %v411_v12  ;;  %2983 = vmatprep.subr.bf16.mxu0 %v2982_v13  ;;  %v414_v21 = vld [vmem:[%s3307_s16 + $0x19] sm:$0xff]  ;;  %v415_v22 = vld [vmem:[%s3307_s16 + $0x21] sm:$0xff]  ;;  %v416_v26 = vld [vmem:[%s3307_s16 + $0x29] sm:$0xff] }
  0x15   : > { %v385_v27 = vld [vmem:[%s3307_s16] sm:$0xff]  ;;  %v386_v31 = vld [vmem:[%s3307_s16 + $0x8] sm:$0xff]  ;;  %v387_v32 = vld [vmem:[%s3307_s16 + $0x10] sm:$0xff]  ;;  %3019 = vmatprep.subr.bf16.mxu1 %v3018_v57 }
  0x16   : > { %2698 = vmatmul.mubr.msk.f32.vlgmr.msra.gmra.mrb[0].mxu0 %vm438_vm0, %v412_v16  ;;  %v417_v35 = vld [vmem:[%s3307_s16 + $0x31] sm:$0xff]  ;;  %v418_v37 = vld [vmem:[%s3307_s16 + $0x39] sm:$0xff]  ;;  %v419_v38 = vld [vmem:[%s3307_s16 + $0x41] sm:$0xff] }
  0x17   : > { %2985 = vmatpush3.bf16.msra.mxu0 %v2982_v13  ;;  %2700 = vmatprep.mubr.msk.f32.mxu0 %vm438_vm0, %v413_v17  ;;  %v388_v39 = vld [vmem:[%s3307_s16 + $0x18] sm:$0xff]  ;;  %v420_v40 = vld [vmem:[%s3307_s16 + $0x49] sm:$0xff]  ;;  %v389_v41 = vld [vmem:[%s3307_s16 + $0x20] sm:$0xff] }
  0x18   : > { %2987 = vmatprep.subr.bf16.mxu0 %v2986_v18  ;;  %2706 = vmatprep.mubr.msk.f32.mxu1 %vm438_vm0, %v417_v35  ;;  %v421_v45 = vld [vmem:[%s3307_s16 + $0x51] sm:$0xff]  ;;  %v390_v46 = vld [vmem:[%s3307_s16 + $0x28] sm:$0xff]  ;;  %v422_v47 = vld [vmem:[%s3307_s16 + $0x59] sm:$0xff] }
  0x19   : > { %2707 = vmatmul.mubr.msk.f32.vlgmr.msra.gmra.mrb[0].mxu1 %vm438_vm0, %v418_v37  ;;  %v391_v48 = vld [vmem:[%s3307_s16 + $0x30] sm:$0xff]  ;;  %v423_v50 = vld [vmem:[%s3307_s16 + $0x61] sm:$0xff]  ;;  %v392_v55 = vld [vmem:[%s3307_s16 + $0x38] sm:$0xff] }
  0x1a   : > { %2701 = vmatmul.mubr.msk.f32.gmra.mrb[2].mxu0 %vm438_vm0, %v414_v21  ;;  %2709 = vmatprep.mubr.msk.f32.mxu1 %vm438_vm0, %v419_v38  ;;  %v424_v56 = vld [vmem:[%s3307_s16 + $0x69] sm:$0xff]  ;;  %v393_v58 = vld [vmem:[%s3307_s16 + $0x40] sm:$0xff]  ;;  %v425_v59 = vld [vmem:[%s3307_s16 + $0x71] sm:$0xff] }
  0x1b   : > { %2989 = vmatpush3.bf16.msra.mxu0 %v2986_v18  ;;  %2703 = vmatprep.mubr.msk.f32.mxu0 %vm438_vm0, %v415_v22  ;;  %v394_v61 = vld [vmem:[%s3307_s16 + $0x48] sm:$0xff]  ;;  %v426_v62 = vld [vmem:[%s3307_s16 + $0x79] sm:$0xff]  ;;  %v395_v63 = vld [vmem:[%s3307_s16 + $0x50] sm:$0xff]  ;;  %v3010_v18 = vpack.c.bf16 %v2469_v15, %v2468_v14 }
  0x1c   : > { %2991 = vmatprep.subr.bf16.mxu0 %v2990_v23  ;;  %v427_v0 = vld [vmem:[%s3307_s16 + $0x81] sm:$0xff]  ;;  %3021 = vmatpush3.bf16.msra.mxu1 %v3018_v57  ;;  %v396_v1 = vld [vmem:[%s3307_s16 + $0x58] sm:$0xff]  ;;  %v428_v2 = vld [vmem:[%s3307_s16 + $0x89] sm:$0xff] }
  0x1d   : > { %2710 = vmatmul.mubr.msk.f32.gmra.mrb[2].mxu1 %vm438_vm0, %v420_v40  ;;  %3023 = vmatprep.subr.bf16.mxu1 %v3022_v60  ;;  %v397_v3 = vld [vmem:[%s3307_s16 + $0x60] sm:$0xff]  ;;  %v429_v4 = vld [vmem:[%s3307_s16 + $0x91] sm:$0xff]  ;;  %v398_v5 = vld [vmem:[%s3307_s16 + $0x68] sm:$0xff] }
  0x1e   : > { %2704 = vmatmul.mubr.msk.f32.gmra.mrb[4].mxu0 %vm438_vm0, %v416_v26  ;;  %2712 = vmatprep.mubr.msk.f32.mxu1 %vm438_vm0, %v421_v45  ;;  %v430_v6 = vld [vmem:[%s3307_s16 + $0x99] sm:$0x7]  ;;  %v399_v7 = vld [vmem:[%s3307_s16 + $0x70] sm:$0xff]  ;;  %v401_v9 = vld [vmem:[%s3307_s16 + $0x80] sm:$0xff] }
  0x1f   : > { %2993 = vmatpush3.bf16.msra.mxu0 %v2990_v23  ;;  %2739 = vmatprep.mubr.msk.f32.mxu0 %vm438_vm0, %v385_v27  ;;  %v400_v8 = vld [vmem:[%s3307_s16 + $0x78] sm:$0xff]  ;;  %v402_v10 = vld [vmem:[%s3307_s16 + $0x88] sm:$0xff]  ;;  %v403_v11 = vld [vmem:[%s3307_s16 + $0x90] sm:$0xff]  ;;  %v3014_v23 = vpack.c.bf16 %v2471_v20, %v2470_v19 }
  0x20   : > { %2995 = vmatprep.subr.bf16.mxu0 %v2994_v28  ;;  %3025 = vmatpush3.bf16.msra.mxu1 %v3022_v60  ;;  %v404_v12 = vld [vmem:[%s3307_s16 + $0x98] sm:$0x7]  ;;  %v889_v13 = vld [vmem:[%s3307_s16 + $0xd] sm:$0xff]  ;;  %v891_v17 = vld [vmem:[%s3307_s16 + $0x1d] sm:$0xff] }
  0x21   : > { %2713 = vmatmul.mubr.msk.f32.gmra.mrb[4].mxu1 %vm438_vm0, %v422_v47  ;;  %v890_v16 = vld [vmem:[%s3307_s16 + $0x15] sm:$0xff]  ;;  %v892_v21 = vld [vmem:[%s3307_s16 + $0x25] sm:$0xff]  ;;  %v893_v22 = vld [vmem:[%s3307_s16 + $0x2d] sm:$0xff] }
  0x22   : > { %2740 = vmatmul.mubr.msk.f32.vlgmr.msra.gmra.mrb[0].mxu0 %vm438_vm0, %v386_v31  ;;  %2715 = vmatprep.mubr.msk.f32.mxu1 %vm438_vm0, %v423_v50  ;;  %v894_v24 = vld [vmem:[%s3307_s16 + $0x35] sm:$0xff]  ;;  %v895_v25 = vld [vmem:[%s3307_s16 + $0x3d] sm:$0xff]  ;;  %v896_v26 = vld [vmem:[%s3307_s16 + $0x45] sm:$0xff] }
  0x23   : > { %2997 = vmatpush3.bf16.msra.mxu0 %v2994_v28  ;;  %2742 = vmatprep.mubr.msk.f32.mxu0 %vm438_vm0, %v387_v32  ;;  %v897_v27 = vld [vmem:[%s3307_s16 + $0x4d] sm:$0xff]  ;;  %v898_v28 = vld [vmem:[%s3307_s16 + $0x55] sm:$0xff]  ;;  %v899_v29 = vld [vmem:[%s3307_s16 + $0x5d] sm:$0xff] }
  0x24   : > { %2999 = vmatprep.subr.bf16.mxu0 %v2998_v33  ;;  %v900_v30 = vld [vmem:[%s3307_s16 + $0x65] sm:$0xff]  ;;  %v901_v31 = vld [vmem:[%s3307_s16 + $0x6d] sm:$0xff]  ;;  %v902_v32 = vld [vmem:[%s3307_s16 + $0x75] sm:$0xff] }
  0x25   : > { %2716 = vmatmul.mubr.msk.f32.gmra.mrb[6].mxu1 %vm438_vm0, %v424_v56  ;;  %v904_v34 = vld [vmem:[%s3307_s16 + $0x85] sm:$0xff]  ;;  %v905_v35 = vld [vmem:[%s3307_s16 + $0x8d] sm:$0xff]  ;;  %v906_v36 = vld [vmem:[%s3307_s16 + $0x95] sm:$0xff] }
  0x26   : > { %2743 = vmatmul.mubr.msk.f32.gmra.mrb[2].mxu0 %vm438_vm0, %v388_v39  ;;  %2718 = vmatprep.mubr.msk.f32.mxu1 %vm438_vm0, %v425_v59  ;;  %v907_v37 = vld [vmem:[%s3307_s16 + $0x9d] sm:$0xff]  ;;  %v908_v38 = vld [vmem:[%s3307_s16 + $0xa5] sm:$0x7]  ;;  %v1161_v39 = vld [vmem:[%s3307_s16 + $0xe] sm:$0xff] }
  0x27   : > { %2745 = vmatprep.mubr.msk.f32.mxu0 %vm438_vm0, %v389_v41  ;;  %3001 = vmatpush3.bf16.msra.mxu0 %v2998_v33  ;;  %v903_v33 = vld [vmem:[%s3307_s16 + $0x7d] sm:$0xff]  ;;  %v1165_v43 = vld [vmem:[%s3307_s16 + $0x2e] sm:$0xff]  ;;  %v1172_v50 = vld [vmem:[%s3307_s16 + $0x66] sm:$0xff] }
  0x28   : > { %3003 = vmatprep.subr.bf16.mxu0 %v3002_v42  ;;  %v1162_v40 = vld [vmem:[%s3307_s16 + $0x16] sm:$0xff]  ;;  %v1163_v41 = vld [vmem:[%s3307_s16 + $0x1e] sm:$0xff]  ;;  %v1169_v47 = vld [vmem:[%s3307_s16 + $0x4e] sm:$0xff] }
  0x29   : > { %2719 = vmatmul.mubr.msk.f32.gmra.mrb[8].mxu1 %vm438_vm0, %v426_v62  ;;  %v1166_v44 = vld [vmem:[%s3307_s16 + $0x36] sm:$0xff]  ;;  %v1167_v45 = vld [vmem:[%s3307_s16 + $0x3e] sm:$0xff]  ;;  %v1173_v51 = vld [vmem:[%s3307_s16 + $0x6e] sm:$0xff] }
  0x2a   : > { %2746 = vmatmul.mubr.msk.f32.gmra.mrb[4].mxu0 %vm438_vm0, %v390_v46  ;;  %2721 = vmatprep.mubr.msk.f32.mxu1 %vm438_vm0, %v427_v0  ;;  %v1168_v46 = vld [vmem:[%s3307_s16 + $0x46] sm:$0xff]  ;;  %v1174_v52 = vld [vmem:[%s3307_s16 + $0x76] sm:$0xff]  ;;  %v1175_v53 = vld [vmem:[%s3307_s16 + $0x7e] sm:$0xff] }
  0x2b   : > { %2748 = vmatprep.mubr.msk.f32.mxu0 %vm438_vm0, %v391_v48  ;;  %3005 = vmatpush3.bf16.msra.mxu0 %v3002_v42  ;;  %v1164_v42 = vld [vmem:[%s3307_s16 + $0x26] sm:$0xff]  ;;  %v1170_v48 = vld [vmem:[%s3307_s16 + $0x56] sm:$0xff]  ;;  %v1179_v57 = vld [vmem:[%s3307_s16 + $0x9e] sm:$0xff] }
  0x2c   : > { %3007 = vmatprep.subr.bf16.mxu0 %v3385_v49  ;;  %v1176_v54 = vld [vmem:[%s3307_s16 + $0x86] sm:$0xff]  ;;  %v1178_v56 = vld [vmem:[%s3307_s16 + $0x96] sm:$0xff] }
  0x2d   : > { %2722 = vmatmul.mubr.msk.f32.gmra.mrb[10].mxu1 %vm438_vm0, %v428_v2 }
  0x2e   : > { %2749 = vmatmul.mubr.msk.f32.gmra.mrb[6].mxu0 %vm438_vm0, %v392_v55  ;;  %2724 = vmatprep.mubr.msk.f32.mxu1 %vm438_vm0, %v429_v4  ;;  %v1177_v55 = vld [vmem:[%s3307_s16 + $0x8e] sm:$0xff] }
  0x2f   : > { %2751 = vmatprep.mubr.msk.f32.mxu0 %vm438_vm0, %v393_v58  ;;  %v1180_v58 = vld [vmem:[%s3307_s16 + $0xa6] sm:$0x7] }
  0x31   : > { %2725 = vmatmul.mubr.msk.f32.gmra.mrb[12].mxu1 %vm438_vm0, %v430_v6 }
  0x32   : > { %2752 = vmatmul.mubr.msk.f32.gmra.mrb[8].mxu0 %vm438_vm0, %v394_v61 }
  0x33   : > { %2754 = vmatprep.mubr.msk.f32.mxu0 %vm438_vm0, %v395_v63 }
  0x36   : > { %2755 = vmatmul.mubr.msk.f32.gmra.mrb[10].mxu0 %vm438_vm0, %v396_v1 }
  0x37   : > { %2757 = vmatprep.mubr.msk.f32.mxu0 %vm438_vm0, %v397_v3 }
  0x3a   : > { %2758 = vmatmul.mubr.msk.f32.gmra.mrb[12].mxu0 %vm438_vm0, %v398_v5 }
  0x3b   : > { %2760 = vmatprep.mubr.msk.f32.mxu0 %vm438_vm0, %v399_v7 }
  0x3e   : > { %2761 = vmatmul.mubr.msk.f32.gmra.mrb[14].mxu0 %vm438_vm0, %v400_v8 }
  0x3f   : > { %2763 = vmatprep.mubr.msk.f32.mxu0 %vm438_vm0, %v401_v9  ;;  %v3556_v9 = vld [vmem:[%s3895_s2] ss:$0 sm:$0xff] }
  0x42   : > { %2764 = vmatmul.mubr.msk.f32.gmra.mrb[16].mxu0 %vm438_vm0, %v402_v10 }
  0x43   : > { %2766 = vmatprep.mubr.msk.f32.mxu0 %vm438_vm0, %v403_v11 }
  0x46   : > { %2767 = vmatmul.mubr.msk.f32.gmra.mrb[18].mxu0 %vm438_vm0, %v404_v12 }
  0x47   : > { %2781 = vmatprep.mubr.msk.f32.mxu0 %vm438_vm0, %v889_v13 }
  0x4a   : > { %2782 = vmatmul.mubr.msk.f32.vlgmr.msra.gmra.mrb[0].mxu0 %vm438_vm0, %v890_v16 }
  0x4b   : > { %3009 = vmatpush3.bf16.msra.mxu0 %v3385_v49  ;;  %2784 = vmatprep.mubr.msk.f32.mxu0 %vm438_vm0, %v891_v17  ;;  %v1171_v49 = vld [vmem:[%s3307_s16 + $0x5e] sm:$0xff] }
  0x4c   : > { %3011 = vmatprep.subr.bf16.mxu0 %v3010_v18 }
  0x4e   : > { %2785 = vmatmul.mubr.msk.f32.gmra.mrb[2].mxu0 %vm438_vm0, %v892_v21 }
  0x4f   : > { %2787 = vmatprep.mubr.msk.f32.mxu0 %vm438_vm0, %v893_v22  ;;  %3013 = vmatpush3.bf16.msra.mxu0 %v3010_v18 }
  0x50   : > { %3015 = vmatprep.subr.bf16.mxu0 %v3014_v23 }
  0x52   : > { %2788 = vmatmul.mubr.msk.f32.gmra.mrb[4].mxu0 %vm438_vm0, %v894_v24 }
  0x53   : > { %2790 = vmatprep.mubr.msk.f32.mxu0 %vm438_vm0, %v895_v25  ;;  %3017 = vmatpush3.bf16.msra.mxu0 %v3014_v23 }
  0x56   : > { %2791 = vmatmul.mubr.msk.f32.gmra.mrb[6].mxu0 %vm438_vm0, %v896_v26 }
  0x57   : > { %2793 = vmatprep.mubr.msk.f32.mxu0 %vm438_vm0, %v897_v27 }
  0x5a   : > { %2794 = vmatmul.mubr.msk.f32.gmra.mrb[8].mxu0 %vm438_vm0, %v898_v28 }
  0x5b   : > { %2796 = vmatprep.mubr.msk.f32.mxu0 %vm438_vm0, %v899_v29 }
  0x5e   : > { %2797 = vmatmul.mubr.msk.f32.gmra.mrb[10].mxu0 %vm438_vm0, %v900_v30 }
  0x5f   : > { %2799 = vmatprep.mubr.msk.f32.mxu0 %vm438_vm0, %v901_v31 }
  0x62   : > { %2800 = vmatmul.mubr.msk.f32.gmra.mrb[12].mxu0 %vm438_vm0, %v902_v32 }
  0x63   : > { %2802 = vmatprep.mubr.msk.f32.mxu0 %vm438_vm0, %v903_v33 }
  0x66   : > { %2803 = vmatmul.mubr.msk.f32.gmra.mrb[14].mxu0 %vm438_vm0, %v904_v34 }
  0x67   : > { %2805 = vmatprep.mubr.msk.f32.mxu0 %vm438_vm0, %v905_v35 }
  0x6a   : > { %2806 = vmatmul.mubr.msk.f32.gmra.mrb[16].mxu0 %vm438_vm0, %v906_v36 }
  0x6b   : > { %2808 = vmatprep.mubr.msk.f32.mxu0 %vm438_vm0, %v907_v37 }
  0x6e   : > { %2809 = vmatmul.mubr.msk.f32.gmra.mrb[18].mxu0 %vm438_vm0, %v908_v38 }
  0x6f   : > { %2823 = vmatprep.mubr.msk.f32.mxu0 %vm438_vm0, %v1161_v39 }
  0x72   : > { %2824 = vmatmul.mubr.msk.f32.vlgmr.msra.gmra.mrb[0].mxu0 %vm438_vm0, %v1162_v40 }
  0x73   : > { %2826 = vmatprep.mubr.msk.f32.mxu0 %vm438_vm0, %v1163_v41 }
  0x76   : > { %2827 = vmatmul.mubr.msk.f32.gmra.mrb[2].mxu0 %vm438_vm0, %v1164_v42 }
  0x77   : > { %2829 = vmatprep.mubr.msk.f32.mxu0 %vm438_vm0, %v1165_v43 }
  0x7a   : > { %2830 = vmatmul.mubr.msk.f32.gmra.mrb[4].mxu0 %vm438_vm0, %v1166_v44 }
  0x7b   : > { %2832 = vmatprep.mubr.msk.f32.mxu0 %vm438_vm0, %v1167_v45 }
  0x7e   : > { %2833 = vmatmul.mubr.msk.f32.gmra.mrb[6].mxu0 %vm438_vm0, %v1168_v46 }
  0x7f   : > { %2835 = vmatprep.mubr.msk.f32.mxu0 %vm438_vm0, %v1169_v47 }
  0x82   : > { %2836 = vmatmul.mubr.msk.f32.gmra.mrb[8].mxu0 %vm438_vm0, %v1170_v48 }
  0x83   : > { %2838 = vmatprep.mubr.msk.f32.mxu0 %vm438_vm0, %v1171_v49 }
  0x86   : > { %2839 = vmatmul.mubr.msk.f32.gmra.mrb[10].mxu0 %vm438_vm0, %v1172_v50 }
  0x87   : > { %2841 = vmatprep.mubr.msk.f32.mxu0 %vm438_vm0, %v1173_v51 }
  0x8a   : > { %2842 = vmatmul.mubr.msk.f32.gmra.mrb[12].mxu0 %vm438_vm0, %v1174_v52 }
  0x8b   : > { %2844 = vmatprep.mubr.msk.f32.mxu0 %vm438_vm0, %v1175_v53 }
  0x8e   : > { %2845 = vmatmul.mubr.msk.f32.gmra.mrb[14].mxu0 %vm438_vm0, %v1176_v54 }
  0x8f   : > { %2847 = vmatprep.mubr.msk.f32.mxu0 %vm438_vm0, %v1177_v55 }
  0x92   : > { %2848 = vmatmul.mubr.msk.f32.gmra.mrb[16].mxu0 %vm438_vm0, %v1178_v56 }
  0x93   : > { %2850 = vmatprep.mubr.msk.f32.mxu0 %vm438_vm0, %v1179_v57 }
  0x96   : > { %2851 = vmatmul.mubr.msk.f32.gmra.mrb[18].mxu0 %vm438_vm0, %v1180_v58 }
  0xec   : > { %v2708_v59 = vpop.f32.mrb[0].mxu1 }
  0xed   : > { %v595_v60 = vpop.f32.mrb[1].mxu1 }
  0xf0   : > { %v2711_v61 = vpop.f32.mrb[2].mxu1 }
  0xf1   : > { %v605_v62 = vpop.f32.mrb[3].mxu1 }
  0xf4   : > { %v2714_v63 = vpop.f32.mrb[4].mxu1 }
  0xf5   : > { %v615_v0 = vpop.f32.mrb[5].mxu1 }
  0xf8   : > { %v2717_v1 = vpop.f32.mrb[6].mxu1 }
  0xf9   : > { %v3539_v2 = vpop.f32.mrb[7].mxu1 }
  0xfc   : > { %v3541_v3 = vpop.f32.mrb[8].mxu1 }
  0xfd   : > { %v3543_v4 = vpop.f32.mrb[9].mxu1 }
 0x100   : > { %v3545_v5 = vpop.f32.mrb[10].mxu1 }
 0x101   : > { %v3547_v6 = vpop.f32.mrb[11].mxu1 }
 0x104   : > { %v3549_v7 = vpop.f32.mrb[12].mxu1 }
 0x105   : > { %v3551_v8 = vpop.f32.mrb[13].mxu1 }
 0x145   : > { %v2825_v10 = vpop.f32.mrb[0].mxu0 }
 0x146   : > { %v3559_v11 = vadd.f32 %v2825_v10, %v3556_v9  ;;  %v1314_v12 = vpop.f32.mrb[1].mxu0 }
 0x147   : > { %v3562_v13 = vadd.f32 %v3556_v9, %v1314_v12 }
 0x148   : > { %v1461_v16 = vmul.f32 %v3559_v11, %v3559_v11 }
 0x149   : > { %v1460_v14 = vmul.f32 %v3562_v13, %v3562_v13  ;;  %v2828_v15 = vpop.f32.mrb[2].mxu0 }
 0x14a   : > { %v3569_v17 = vadd.f32 %v2828_v15, %v3556_v9  ;;  %v1324_v18 = vpop.f32.mrb[3].mxu0 }
 0x14b   : > { %v3572_v19 = vadd.f32 %v3556_v9, %v1324_v18  ;;  %2861 = vmatprep.mubr.msk.f32.mxu1 %vm1491_vm1, %v1460_v14 }
 0x14c   : > { %2862 = vmatmul.mubr.msk.f32.vlgmr.msra.gmra.mrb[14].mxu1 %vm1491_vm1, %v1461_v16  ;;  %v1463_v22 = vmul.f32 %v3569_v17, %v3569_v17 }
 0x14d   : > { %v1462_v20 = vmul.f32 %v3572_v19, %v3572_v19  ;;  %v2831_v21 = vpop.f32.mrb[4].mxu0 }
 0x14e   : > { %v3581_v23 = vadd.f32 %v2831_v21, %v3556_v9  ;;  %v1334_v24 = vpop.f32.mrb[5].mxu0 }
 0x14f   : > { %v3584_v25 = vadd.f32 %v3556_v9, %v1334_v24  ;;  %2864 = vmatprep.mubr.msk.f32.mxu1 %vm1491_vm1, %v1462_v20 }
 0x150   : > { %2865 = vmatmul.mubr.msk.f32.gmra.mrb[16].mxu1 %vm1491_vm1, %v1463_v22  ;;  %v1465_v28 = vmul.f32 %v3581_v23, %v3581_v23 }
 0x151   : > { %v1464_v26 = vmul.f32 %v3584_v25, %v3584_v25  ;;  %v2834_v27 = vpop.f32.mrb[6].mxu0 }
 0x152   : > { %v3080_v29 = vadd.f32 %v2834_v27, %v2708_v59  ;;  %v1344_v30 = vpop.f32.mrb[7].mxu0 }
 0x153   : > { %v3081_v31 = vadd.f32 %v1344_v30, %v595_v60  ;;  %2867 = vmatprep.mubr.msk.f32.mxu1 %vm1491_vm1, %v1464_v26  ;;  %v1829_v30 = vld [vmem:[%s3898_s5 + $0x10] sm:$0xff] }
 0x154   : > { %v3594_v32 = vadd.f32 %v3080_v29, %v3556_v9  ;;  %2868 = vmatmul.mubr.msk.f32.gmra.mrb[18].mxu1 %vm1491_vm1, %v1465_v28  ;;  %v3209_v28 = vmov 0.0|0.0  }
 0x155   : > { %v3598_v33 = vadd.f32 %v3081_v31, %v3556_v9  ;;  %v2837_v34 = vpop.f32.mrb[8].mxu0  ;;  %3026 = vmatprep.subr.bf16.mxu1 %v3209_v28  ;;  %v1830_v31 = vld [vmem:[%s3898_s5 + $0x18] sm:$0xff] }
 0x156   : > { %v3082_v35 = vadd.f32 %v2837_v34, %v2711_v61  ;;  %v1354_v36 = vpop.f32.mrb[9].mxu0  ;;  %v1467_v39 = vmul.f32 %v3594_v32, %v3594_v32  ;;  %v3030_v34 = vpack.c.bf16 %v1830_v31, %v1829_v30 }
 0x157   : > { %v1466_v37 = vmul.f32 %v3598_v33, %v3598_v33  ;;  %v3083_v38 = vadd.f32 %v1354_v36, %v605_v62  ;;  %v3705_v36 = vld [vmem:[%s3897_s4] ss:$0 sm:$0xff] }
 0x158   : > { %v3605_v40 = vadd.f32 %v3082_v35, %v3556_v9  ;;  %v3211_v35 = vmov 0.0  }
 0x159   : > { %v3608_v41 = vadd.f32 %v3083_v38, %v3556_v9  ;;  %v2840_v42 = vpop.f32.mrb[10].mxu0  ;;  %2870 = vmatprep.mubr.msk.f32.mxu1 %vm1491_vm1, %v1466_v37 }
 0x15a   : > { %v3084_v43 = vadd.f32 %v2840_v42, %v2714_v63  ;;  %v1364_v44 = vpop.f32.mrb[11].mxu0  ;;  %2871 = vmatmul.mubr.msk.f32.gmra.mrb[20].mxu1 %vm1491_vm1, %v1467_v39  ;;  %v1469_v47 = vmul.f32 %v3605_v40, %v3605_v40 }
 0x15b   : > { %v1468_v45 = vmul.f32 %v3608_v41, %v3608_v41  ;;  %v3085_v46 = vadd.f32 %v1364_v44, %v615_v0 }
 0x15c   : > { %v3617_v48 = vadd.f32 %v3084_v43, %v3556_v9 }
 0x15d   : > { %v3620_v49 = vadd.f32 %v3085_v46, %v3556_v9  ;;  %v2843_v50 = vpop.f32.mrb[12].mxu0  ;;  %2873 = vmatprep.mubr.msk.f32.mxu1 %vm1491_vm1, %v1468_v45 }
 0x15e   : > { %v3086_v51 = vadd.f32 %v2843_v50, %v2717_v1  ;;  %v1374_v52 = vpop.f32.mrb[13].mxu0  ;;  %2874 = vmatmul.mubr.msk.f32.gmra.mrb[22].mxu1 %vm1491_vm1, %v1469_v47  ;;  %v1471_v55 = vmul.f32 %v3617_v48, %v3617_v48 }
 0x15f   : > { %v1470_v53 = vmul.f32 %v3620_v49, %v3620_v49  ;;  %v3087_v54 = vadd.f32 %v1374_v52, %v3539_v2 }
 0x160   : > { %v3630_v56 = vadd.f32 %v3086_v51, %v3556_v9 }
 0x161   : > { %v3633_v57 = vadd.f32 %v3087_v54, %v3556_v9  ;;  %v2846_v58 = vpop.f32.mrb[14].mxu0  ;;  %2876 = vmatprep.mubr.msk.f32.mxu1 %vm1491_vm1, %v1470_v53 }
 0x162   : > { %v3088_v59 = vadd.f32 %v2846_v58, %v3541_v3  ;;  %v1384_v60 = vpop.f32.mrb[15].mxu0  ;;  %2877 = vmatmul.mubr.msk.f32.gmra.mrb[24].mxu1 %vm1491_vm1, %v1471_v55  ;;  %v1473_v63 = vmul.f32 %v3630_v56, %v3630_v56 }
 0x163   : > { %v1472_v61 = vmul.f32 %v3633_v57, %v3633_v57  ;;  %v3089_v62 = vadd.f32 %v1384_v60, %v3543_v4 }
 0x164   : > { %v3644_v0 = vadd.f32 %v3088_v59, %v3556_v9 }
 0x165   : > { %v3647_v1 = vadd.f32 %v3089_v62, %v3556_v9  ;;  %v2849_v2 = vpop.f32.mrb[16].mxu0  ;;  %2879 = vmatprep.mubr.msk.f32.mxu1 %vm1491_vm1, %v1472_v61 }
 0x166   : > { %v3090_v3 = vadd.f32 %v2849_v2, %v3545_v5  ;;  %v1394_v10 = vpop.f32.mrb[17].mxu0  ;;  %2880 = vmatmul.mubr.msk.f32.gmra.mrb[26].mxu1 %vm1491_vm1, %v1473_v63  ;;  %v1475_v14 = vmul.f32 %v3644_v0, %v3644_v0 }
 0x167   : > { %v1474_v4 = vmul.f32 %v3647_v1, %v3647_v1  ;;  %v3091_v12 = vadd.f32 %v1394_v10, %v3547_v6 }
 0x168   : > { %v3658_v15 = vadd.f32 %v3090_v3, %v3556_v9 }
 0x169   : > { %v3661_v16 = vadd.f32 %v3091_v12, %v3556_v9  ;;  %v2852_v18 = vpop.f32.mrb[18].mxu0  ;;  %2882 = vmatprep.mubr.msk.f32.mxu1 %vm1491_vm1, %v1474_v4 }
 0x16a   : > { %v3092_v5 = vadd.f32 %v2852_v18, %v3549_v7  ;;  %v1404_v20 = vpop.f32.mrb[19].mxu0  ;;  %2883 = vmatmul.mubr.msk.f32.gmra.mrb[28].mxu1 %vm1491_vm1, %v1475_v14  ;;  %v1477_v22 = vmul.f32 %v3658_v15, %v3658_v15 }
 0x16b   : > { %v1476_v6 = vmul.f32 %v3661_v16, %v3661_v16  ;;  %v3093_v21 = vadd.f32 %v1404_v20, %v3551_v8  ;;  %v1827_v8 = vld [vmem:[%s3898_s5] sm:$0xff] }
 0x16c   : > { %v3672_v24 = vadd.f32 %v3092_v5, %v3556_v9 }
 0x16d   : > { %v3675_v26 = vadd.f32 %v3093_v21, %v3556_v9  ;;  %2885 = vmatprep.mubr.msk.f32.mxu1 %vm1491_vm1, %v1476_v6  ;;  %v1828_v9 = vld [vmem:[%s3898_s5 + $0x8] sm:$0xff] }
 0x16e   : > { %2886 = vmatmul.mubr.msk.f32.gmra.mrb[30].mxu1 %vm1491_vm1, %v1477_v22  ;;  %v1479_v27 = vmul.f32 %v3672_v24, %v3672_v24  ;;  %v3027_v29 = vpack.c.bf16 %v1828_v9, %v1827_v8 }
 0x16f   : > { %v1478_v7 = vmul.f32 %v3675_v26, %v3675_v26 }
 0x170   : > { %3028 = vmatpush3.bf16.msra.mxu1 %v3027_v29 }
 0x171   : > { %2888 = vmatprep.mubr.msk.f32.mxu1 %vm1491_vm1, %v1478_v7  ;;  %3029 = vmatprep.subr.bf16.mxu1 %v3209_v28 }
 0x172   : > { %2889 = vmatmul.mubr.msk.f32.gmra.mrb[32].mxu1 %vm1491_vm1, %v1479_v27 }
 0x173   : > { %2899 = vmatprep.mubr.msk.f32.mxu1 %vm3210_vm2, %v3211_v35 }
 0x174   : > { %3031 = vmatpush3.bf16.msra.mxu1 %v3030_v34 }
 0x175   : > { %3032 = vmatprep.subr.bf16.mxu1 %v3209_v28 }
 0x21f   : > { %v2863_v37 = vpop.f32.mrb[14].mxu1 }
 0x220   : > { %v1624_v38 = vadd.f32 %v2863_v37, %v3705_v36  ;;  %v1618_v39 = vpop.f32.mrb[15].mxu1 }
 0x221   : > { %v1619_v43 = vadd.f32 %v3705_v36, %v1618_v39 }
 0x222   : > { %3159 = vrsqrt.f32 %v1624_v38 }
 0x223   : > { %v2866_v42 = vpop.f32.mrb[16].mxu1 }
 0x224   : > { %v1634_v44 = vadd.f32 %v2866_v42, %v3705_v36  ;;  %v1628_v45 = vpop.f32.mrb[17].mxu1 }
 0x225   : > { %v1629_v46 = vadd.f32 %v3705_v36, %v1628_v45 }
 0x226   : > { %3161 = vrsqrt.f32 %v1634_v44 }
 0x227   : > { %3163 = vrsqrt.f32 %v1629_v46  ;;  %v2869_v47 = vpop.f32.mrb[18].mxu1 }
 0x228   : > { %3165 = vrsqrt.f32 %v1619_v43  ;;  %v1644_v50 = vadd.f32 %v2869_v47, %v3705_v36  ;;  %v1638_v51 = vpop.f32.mrb[19].mxu1 }
 0x229   : > { %v1639_v52 = vadd.f32 %v3705_v36, %v1638_v51 }
 0x22a   : > { %3167 = vrsqrt.f32 %v1644_v50 }
 0x22b   : > { %3169 = vrsqrt.f32 %v1639_v52 }
 0x22c   : > { %v3160_v53 = vpop.eup %3159 }
 0x22d   : > { %v2872_v54 = vpop.f32.mrb[20].mxu1  ;;  %v1738_v61 = vmul.f32 %v3160_v53, %v3559_v11 }
 0x22e   : > { %v1654_v55 = vadd.f32 %v2872_v54, %v3705_v36  ;;  %v1648_v58 = vpop.f32.mrb[21].mxu1 }
 0x22f   : > { %v1649_v59 = vadd.f32 %v3705_v36, %v1648_v58  ;;  %v1762_v20 = vrot.slane %v1738_v61, 5 }
 0x230   : > { %v3162_v60 = vpop.eup %3161  ;;  %3171 = vrsqrt.f32 %v1654_v55 }
 0x231   : > { %v3164_v62 = vpop.eup %3163  ;;  %v1740_v63 = vmul.f32 %v3162_v60, %v3569_v17  ;;  %3173 = vrsqrt.f32 %v1649_v59  ;;  %v2875_v2 = vpop.f32.mrb[22].mxu1 }
 0x232   : > { %v3166_v3 = vpop.eup %3165  ;;  %v1739_v10 = vmul.f32 %v3164_v62, %v3572_v19  ;;  %v1664_v4 = vadd.f32 %v2875_v2, %v3705_v36  ;;  %v1658_v12 = vpop.f32.mrb[23].mxu1 }
 0x233   : > { %v1765_v14 = vrot.slane %v1740_v63, 5  ;;  %v1659_v18 = vadd.f32 %v3705_v36, %v1658_v12  ;;  %v1737_v17 = vmul.f32 %v3166_v3, %v3562_v13  ;;  %v1773_v13 = vrot.slane %v1740_v63, 2 }
 0x234   : > { %v3168_v5 = vpop.eup %3167  ;;  %v1763_v6 = vrot.slane %v1739_v10, 5  ;;  %3175 = vrsqrt.f32 %v1664_v4 }
 0x235   : > { %v3170_v11 = vpop.eup %3169  ;;  %v1742_v21 = vmul.f32 %v3168_v5, %v3581_v23  ;;  %3177 = vrsqrt.f32 %v1659_v18  ;;  %v2878_v19 = vpop.f32.mrb[24].mxu1 }
 0x236   : > { %v1764_v22 = vsel %vm1761_vm3, %v1762_v20, %v1763_v6  ;;  %v1766_v7 = vsel %vm1761_vm3, %v1763_v6, %v1765_v14  ;;  %v1741_v27 = vmul.f32 %v3170_v11, %v3584_v25  ;;  %v1674_v8 = vadd.f32 %v2878_v19, %v3705_v36  ;;  %v1668_v9 = vpop.f32.mrb[25].mxu1 }
 0x237   : > { %v1769_v29 = vmax.f32 %v1737_v17, %v1764_v22  ;;  %v1784_v30 = vrot.slane %v1742_v21, 7  ;;  %v1770_v31 = vmax.f32 %v1738_v61, %v1766_v7  ;;  %v1669_v34 = vadd.f32 %v3705_v36, %v1668_v9 }
 0x238   : > { %v1774_v37 = vrot.slane %v1741_v27, 2  ;;  %v1783_v23 = vrot.slane %v1741_v27, 7  ;;  %3179 = vrsqrt.f32 %v1674_v8 }
 0x239   : > { %v2881_v38 = vpop.f32.mrb[26].mxu1  ;;  %3181 = vrsqrt.f32 %v1669_v34 }
 0x23a   : > { %v3172_v39 = vpop.eup %3171  ;;  %v1775_v42 = vsel %vm1772_vm4, %v1773_v13, %v1774_v37  ;;  %v1779_v43 = vmax.f32 %v1770_v31, %v1774_v37  ;;  %v1785_v44 = vsel %vm1782_vm5, %v1783_v23, %v1784_v30  ;;  %v1684_v25 = vadd.f32 %v2881_v38, %v3705_v36  ;;  %v1678_v45 = vpop.f32.mrb[27].mxu1 }
 0x23b   : > { %v3174_v46 = vpop.eup %3173  ;;  %v1778_v47 = vmax.f32 %v1769_v29, %v1775_v42  ;;  %v1744_v50 = vmul.f32 %v3172_v39, %v3594_v32  ;;  %v1679_v51 = vadd.f32 %v3705_v36, %v1678_v45 }
 0x23c   : > { %v1743_v52 = vmul.f32 %v3174_v46, %v3598_v33  ;;  %3183 = vrsqrt.f32 %v1684_v25 }
 0x23d   : > { %v1790_v53 = vmax.f32 %v1778_v47, %v1785_v44  ;;  %v1795_v54 = vrot.slane %v1744_v50, 4  ;;  %3185 = vrsqrt.f32 %v1679_v51  ;;  %v2884_v55 = vpop.f32.mrb[28].mxu1 }
 0x23e   : > { %v3176_v58 = vpop.eup %3175  ;;  %v1786_v59 = vrot.slane %v1743_v52, 7  ;;  %v1794_v60 = vrot.slane %v1743_v52, 4  ;;  %v1694_v61 = vadd.f32 %v2884_v55, %v3705_v36  ;;  %v1688_v62 = vpop.f32.mrb[29].mxu1 }
 0x23f   : > { %v3178_v63 = vpop.eup %3177  ;;  %v1746_v32 = vmul.f32 %v3176_v58, %v3605_v40  ;;  %v1689_v2 = vadd.f32 %v3705_v36, %v1688_v62 }
 0x240   : > { %v1787_v33 = vsel %vm1782_vm5, %v1784_v30, %v1786_v59  ;;  %v1796_v3 = vsel %vm1793_vm6, %v1794_v60, %v1795_v54  ;;  %v1745_v10 = vmul.f32 %v3178_v63, %v3608_v41  ;;  %3187 = vrsqrt.f32 %v1694_v61  ;;  %v1919_v63 = vld [vmem:[%s3898_s5 + $0x28] sm:$0xff] }
 0x241   : > { %v1791_v4 = vmax.f32 %v1779_v43, %v1787_v33  ;;  %v1799_v12 = vmax.f32 %v1790_v53, %v1796_v3  ;;  %v1805_v14 = vrot.slane %v1746_v32, 1  ;;  %3189 = vrsqrt.f32 %v1689_v2  ;;  %v2887_v18 = vpop.f32.mrb[30].mxu1 }
 0x242   : > { %v3180_v5 = vpop.eup %3179  ;;  %v1804_v20 = vrot.slane %v1745_v10, 1  ;;  %v1704_v6 = vadd.f32 %v2887_v18, %v3705_v36  ;;  %v1698_v40 = vpop.f32.mrb[31].mxu1 }
 0x243   : > { %v1800_v11 = vmax.f32 %v1791_v4, %v1795_v54  ;;  %v1748_v17 = vmul.f32 %v3180_v5, %v3617_v48  ;;  %v1699_v21 = vadd.f32 %v3705_v36, %v1698_v40  ;;  %v3182_v41 = vpop.eup %3181 }
 0x244   : > { %v1806_v19 = vsel %vm1803_vm7, %v1804_v20, %v1805_v14  ;;  %3191 = vrsqrt.f32 %v1704_v6  ;;  %v1747_v44 = vmul.f32 %v3182_v41, %v3620_v49 }
 0x245   : > { %v3743_v22 = vmax.f32 %v1800_v11, %v1805_v14  ;;  %v1809_v7 = vmax.f32 %v1799_v12, %v1806_v19  ;;  %v1999_v27 = vrot.slane %v1748_v17, 5  ;;  %3193 = vrsqrt.f32 %v1699_v21  ;;  %v2890_v8 = vpop.f32.mrb[32].mxu1  ;;  %v1920_v11 = vld [vmem:[%s3898_s5 + $0x30] sm:$0xff] }
 0x246   : > { %v3184_v9 = vpop.eup %3183  ;;  %v1714_v29 = vadd.f32 %v2890_v8, %v3705_v36  ;;  %v1708_v30 = vpop.f32.mrb[33].mxu1 }
 0x247   : > { %v3186_v31 = vpop.eup %3185  ;;  %v2005_v34 = vmax.f32 %v1746_v32, %v1999_v27  ;;  %v1750_v48 = vmul.f32 %v3184_v9, %v3630_v56  ;;  %v1709_v13 = vadd.f32 %v3705_v36, %v1708_v30  ;;  %v1812_v37 = vrot.slane %v1809_v7, 1 }
 0x248   : > { %v1749_v23 = vmul.f32 %v3186_v31, %v3633_v57  ;;  %3195 = vrsqrt.f32 %v1714_v29  ;;  %v1815_v42 = vrot.slane %v1809_v7, 2  ;;  %v1818_v45 = vrot.slane %v1809_v7, 3 }
 0x249   : > { %v2010_v38 = vrot.slane %v1750_v48, 2  ;;  %3197 = vrsqrt.f32 %v1709_v13  ;;  %v1814_v39 = vmax.f32 %v1809_v7, %v1812_v37  ;;  %v1906_v46 = vrot.slane %v3743_v22, 2 }
 0x24a   : > { %v3188_v43 = vpop.eup %3187  ;;  %v2000_v25 = vrot.slane %v1749_v23, 5  ;;  %v1909_v51 = vrot.slane %v3743_v22, 3  ;;  %v1821_v59 = vrot.slane %v1809_v7, 4  ;;  %v1824_v3 = vrot.slane %v1809_v7, 5 }
 0x24b   : > { %v3190_v47 = vpop.eup %3189  ;;  %v2016_v50 = vmax.f32 %v2005_v34, %v2010_v38  ;;  %v1752_v56 = vmul.f32 %v3188_v43, %v3644_v0  ;;  %v1817_v36 = vmax.f32 %v1814_v39, %v1815_v42  ;;  %v1908_v54 = vmax.f32 %v1814_v39, %v1906_v46  ;;  %v1918_v0 = vld [vmem:[%s3898_s5 + $0x20] sm:$0xff]  ;;  %v2073_v39 = vld [vmem:[%s3898_s5 + $0x48] sm:$0xff] }
 0x24c   : > { %v2001_v57 = vsel %vm1761_vm3, %v1999_v27, %v2000_v25  ;;  %v2007_v52 = vmax.f32 %v1748_v17, %v2000_v25  ;;  %v1751_v53 = vmul.f32 %v3190_v47, %v3647_v1  ;;  %v1912_v10 = vrot.slane %v3743_v22, 4 }
 0x24d   : > { %v2006_v55 = vmax.f32 %v1747_v44, %v2001_v57  ;;  %v2022_v58 = vrot.slane %v1752_v56, 7  ;;  %v1820_v49 = vmax.f32 %v1817_v36, %v1818_v45  ;;  %v1911_v32 = vmax.f32 %v1908_v54, %v1909_v51  ;;  %v2074_v56 = vld [vmem:[%s3898_s5 + $0x50] sm:$0xff]  ;;  %v2075_v36 = vld [vmem:[%s3898_s5 + $0x58] sm:$0xff] }
 0x24e   : > { %v3192_v60 = vpop.eup %3191  ;;  %v2011_v61 = vrot.slane %v1751_v53, 2  ;;  %v2021_v62 = vrot.slane %v1751_v53, 7  ;;  %v3033_v40 = vpack.c.bf16 %v1919_v63, %v1918_v0  ;;  %v1915_v41 = vrot.slane %v3743_v22, 5 }
 0x24f   : > { %v3194_v2 = vpop.eup %3193  ;;  %v1754_v1 = vmul.f32 %v3192_v60, %v3658_v15  ;;  %v1823_v33 = vmax.f32 %v1820_v49, %v1821_v59  ;;  %v1921_v15 = vld [vmem:[%s3898_s5 + $0x38] sm:$0xff]  ;;  %v1914_v19 = vmax.f32 %v1911_v32, %v1912_v10  ;;  %v3042_v53 = vpack.c.bf16 %v2075_v36, %v2074_v56 }
 0x250   : > { %v2012_v4 = vsel %vm1772_vm4, %v2010_v38, %v2011_v61  ;;  %v2018_v12 = vmax.f32 %v2007_v52, %v2011_v61  ;;  %v2023_v14 = vsel %vm1782_vm5, %v2021_v62, %v2022_v58  ;;  %v2029_v18 = vmax.f32 %v2016_v50, %v2021_v62 }
 0x251   : > { %v2017_v5 = vmax.f32 %v2006_v55, %v2012_v4  ;;  %v2034_v20 = vrot.slane %v1754_v1, 4  ;;  %v1753_v6 = vmul.f32 %v3194_v2, %v3661_v16  ;;  %v1826_v21 = vmax.f32 %v1823_v33, %v1824_v3  ;;  %v2163_v2 = vld [vmem:[%s3898_s5 + $0x60] sm:$0xff] }
 0x252   : > { %v3196_v17 = vpop.eup %3195  ;;  %v3036_v30 = vpack.c.bf16 %v1921_v15, %v1920_v11  ;;  %v1917_v31 = vmax.f32 %v1914_v19, %v1915_v41  ;;  %v2044_v22 = vrot.slane %v1754_v1, 1  ;;  %v2164_v1 = vld [vmem:[%s3898_s5 + $0x68] sm:$0xff]  ;;  %v2247_v41 = vld [vmem:[%s3900_s7 + $0x20] sm:$0xff] }
 0x253   : > { %v3198_v7 = vpop.eup %3197  ;;  %v2030_v27 = vmax.f32 %v2017_v5, %v2023_v14  ;;  %v2024_v8 = vrot.slane %v1753_v6, 7  ;;  %v2033_v9 = vrot.slane %v1753_v6, 4  ;;  %v1756_v16 = vmul.f32 %v3196_v17, %v3672_v24  ;;  %2900 = vmatmul.mubr.msk.f32.vlgmr.msra.gmra.mrb[34].mxu1 %vm1491_vm1, %v1826_v21  ;;  %v2166_v5 = vld [vmem:[%s3898_s5 + $0x78] sm:$0xff]  ;;  %v2243_v6 = vld [vmem:[%s3900_s7] sm:$0xff]  ;;  %v2245_v17 = vld [vmem:[%s3900_s7 + $0x10] sm:$0xff] }
 0x254   : > { %v1755_v29 = vmul.f32 %v3198_v7, %v3675_v26  ;;  %3034 = vmatpush3.bf16.msra.mxu1 %v3033_v40  ;;  %2910 = vmatprep.mubr.msk.f32.mxu1 %vm3210_vm2, %v3211_v35  ;;  %v2072_v26 = vld [vmem:[%s3898_s5 + $0x40] sm:$0xff]  ;;  %v1923_v50 = vrot.slane %v1917_v31, 6  ;;  %v3045_v4 = vpack.c.bf16 %v2164_v1, %v2163_v2  ;;  %v2244_v40 = vld [vmem:[%s3900_s7 + $0x8] sm:$0xff]  ;;  %v2246_v21 = vld [vmem:[%s3900_s7 + $0x18] sm:$0xff] }
 0x255   : > { %v2025_v34 = vsel %vm1782_vm5, %v2022_v58, %v2024_v8  ;;  %v2035_v48 = vsel %vm1793_vm6, %v2033_v9, %v2034_v20  ;;  %v2039_v13 = vmax.f32 %v2029_v18, %v2033_v9  ;;  %v2047_v37 = vrot.slane %v1756_v16, 1  ;;  %3035 = vmatprep.subr.bf16.mxu1 %v3209_v28  ;;  %v2165_v18 = vld [vmem:[%s3898_s5 + $0x70] sm:$0xff]  ;;  %v2248_v7 = vld [vmem:[%s3900_s7 + $0x28] sm:$0xff]  ;;  %v2251_v16 = vld [vmem:[%s3900_s7 + $0x40] sm:$0xff] }
 0x256   : > { %v2040_v23 = vmax.f32 %v2030_v27, %v2035_v48  ;;  %v2031_v38 = vmax.f32 %v2018_v12, %v2025_v34  ;;  %v2045_v24 = vrot.slane %v1755_v29, 1  ;;  %v3039_v46 = vpack.c.bf16 %v2073_v39, %v2072_v26  ;;  %v2249_v8 = vld [vmem:[%s3900_s7 + $0x30] sm:$0xff]  ;;  %v2252_v29 = vld [vmem:[%s3900_s7 + $0x48] sm:$0xff]  ;;  %v2254_v34 = vld [vmem:[%s3900_s7 + $0x58] sm:$0xff] }
 0x257   : > { %v3051_v11 = vpack.c.bf16 %v2244_v40, %v2243_v6  ;;  %v3054_v19 = vpack.c.bf16 %v2246_v21, %v2245_v17  ;;  %v3057_v27 = vpack.c.bf16 %v2248_v7, %v2247_v41  ;;  %v2253_v31 = vld [vmem:[%s3900_s7 + $0x50] sm:$0xff]  ;;  %v1757_v26 = vld [vmem:[%s3899_s6] sm:$0x1] }
 0x258   : > { %v2041_v42 = vmax.f32 %v2031_v38, %v2034_v20  ;;  %v2046_v43 = vsel %vm1803_vm7, %v2044_v22, %v2045_v24  ;;  %v2048_v44 = vsel %vm1803_vm7, %v2045_v24, %v2047_v37  ;;  %3037 = vmatpush3.bf16.msra.mxu1 %v3036_v30  ;;  %v3048_v20 = vpack.c.bf16 %v2166_v5, %v2165_v18  ;;  %v2258_v38 = vld [vmem:[%s3900_s7 + $0x78] sm:$0xff] }
 0x259   : > { %v2052_v25 = vmax.f32 %v2039_v13, %v2046_v43  ;;  %v2053_v45 = vmax.f32 %v2040_v23, %v2048_v44  ;;  %3038 = vmatprep.subr.bf16.mxu1 %v3209_v28  ;;  %v3063_v30 = vpack.c.bf16 %v2252_v29, %v2251_v16  ;;  %v3066_v48 = vpack.c.bf16 %v2254_v34, %v2253_v31  ;;  %v2255_v13 = vld [vmem:[%s3900_s7 + $0x60] sm:$0xff]  ;;  %v2257_v23 = vld [vmem:[%s3900_s7 + $0x70] sm:$0xff] }
 0x25a   : > { %v2054_v47 = vmax.f32 %v2041_v42, %v2047_v37  ;;  %v2256_v37 = vld [vmem:[%s3900_s7 + $0x68] sm:$0xff]  ;;  %v3072_v24 = vpack.c.bf16 %v2258_v38, %v2257_v23 }
 0x25b   : > { %v2056_v51 = vrot.slane %v2052_v25, 1  ;;  %2911 = vmatmul.mubr.msk.f32.vlgmr.msra.gmra.mrb[34].mxu1 %vm1491_vm1, %v1923_v50  ;;  %v2151_v57 = vrot.slane %v2053_v45, 1  ;;  %v2060_v54 = vrot.slane %v2053_v45, 2  ;;  %v2063_v49 = vrot.slane %v2053_v45, 3  ;;  %v2332_v50 = vld [vmem:[%s3902_s9] sm:$0x1] }
 0x25c   : > { %3040 = vmatpush3.bf16.msra.mxu1 %v3039_v46  ;;  %2921 = vmatprep.mubr.msk.f32.mxu1 %vm3210_vm2, %v3211_v35  ;;  %v2066_v61 = vrot.slane %v2053_v45, 4  ;;  %v2157_v0 = vrot.slane %v2054_v47, 4  ;;  %v2069_v32 = vrot.slane %v2053_v45, 5  ;;  %v2160_v3 = vrot.slane %v2054_v47, 5 }
 0x25d   : > { %v2058_v52 = vmax.f32 %v2052_v25, %v2056_v51  ;;  %3041 = vmatprep.subr.bf16.mxu1 %v3209_v28  ;;  %v2153_v55 = vmax.f32 %v2053_v45, %v2151_v57  ;;  %v3069_v22 = vpack.c.bf16 %v2256_v37, %v2255_v13  ;;  %v2337_v57 = vld [vmem:[#allocation2] sm:$0x1] }
 0x25f   : > { %v2062_v58 = vmax.f32 %v2058_v52, %v2060_v54  ;;  %v2154_v59 = vmax.f32 %v2153_v55, %v2060_v54 }
 0x260   : > { %3043 = vmatpush3.bf16.msra.mxu1 %v3042_v53 }
 0x261   : > { %v2065_v60 = vmax.f32 %v2062_v58, %v2063_v49  ;;  %3044 = vmatprep.subr.bf16.mxu1 %v3209_v28  ;;  %v2155_v62 = vmax.f32 %v2154_v59, %v2063_v49 }
 0x263   : > { %v2068_v63 = vmax.f32 %v2065_v60, %v2066_v61  ;;  %v2159_v33 = vmax.f32 %v2155_v62, %v2157_v0 }
 0x265   : > { %v2071_v10 = vmax.f32 %v2068_v63, %v2069_v32  ;;  %v2162_v12 = vmax.f32 %v2159_v33, %v2160_v3 }
 0x267   : > { %v2077_v14 = vrot.slane %v2071_v10, 6  ;;  %v2168_v15 = vrot.slane %v2162_v12, 4 }
 0x269   : > { %2922 = vmatmul.mubr.msk.f32.vlgmr.msra.gmra.mrb[34].mxu1 %vm1491_vm1, %v2077_v14 }
 0x26a   : > { %3046 = vmatpush3.bf16.msra.mxu1 %v3045_v4  ;;  %2932 = vmatprep.mubr.msk.f32.mxu1 %vm3210_vm2, %v3211_v35 }
 0x26b   : > { %3047 = vmatprep.subr.bf16.mxu1 %v3209_v28 }
 0x26e   : > { %3049 = vmatpush3.bf16.msra.mxu1 %v3048_v20 }
 0x26f   : > { %3050 = vmatprep.subr.bf16.mxu1 %v3209_v28 }
 0x271   : > { %2933 = vmatmul.mubr.msk.f32.vlgmr.msra.gmra.mrb[34].mxu1 %vm1491_vm1, %v2168_v15 }
 0x272   : > { %3052 = vmatpush3.bf16.msra.mxu1 %v3051_v11  ;;  %2967 = vmatprep.mubr.msk.f32.mxu1 %vm3210_vm2, %v3211_v35  ;;  %v2250_v35 = vld [vmem:[%s3900_s7 + $0x38] sm:$0xff] }
 0x273   : > { %3053 = vmatprep.subr.bf16.mxu1 %v3209_v28  ;;  %v3060_v9 = vpack.c.bf16 %v2250_v35, %v2249_v8 }
 0x276   : > { %3055 = vmatpush3.bf16.msra.mxu1 %v3054_v19 }
 0x277   : > { %3056 = vmatprep.subr.bf16.mxu1 %v3209_v28 }
 0x27a   : > { %3058 = vmatpush3.bf16.msra.mxu1 %v3057_v27 }
 0x27b   : > { %3059 = vmatprep.subr.bf16.mxu1 %v3209_v28 }
 0x27e   : > { %3061 = vmatpush3.bf16.msra.mxu1 %v3060_v9 }
 0x27f   : > { %3062 = vmatprep.subr.bf16.mxu1 %v3209_v28 }
 0x282   : > { %3064 = vmatpush3.bf16.msra.mxu1 %v3063_v30 }
 0x283   : > { %3065 = vmatprep.subr.bf16.mxu1 %v3209_v28 }
 0x286   : > { %3067 = vmatpush3.bf16.msra.mxu1 %v3066_v48 }
 0x287   : > { %3068 = vmatprep.subr.bf16.mxu1 %v3209_v28 }
 0x28a   : > { %3070 = vmatpush3.bf16.msra.mxu1 %v3069_v22 }
 0x28b   : > { %3071 = vmatprep.subr.bf16.mxu1 %v3209_v28  ;;  %v2259_v28 = vld [vmem:[%s3901_s8] sm:$0x1] }
 0x28e   : > { %3073 = vmatpush3.bf16.msra.mxu1 %v3072_v24 }
 0x344   : > { %v2237_v39 = vpop.f32.mrb[34].mxu1 }
 0x345   : > { %v3094_v42 = vadd.f32 %v2237_v39, %v1757_v26  ;;  %v2934_v43 = vpop.f32.mrb[35].mxu1 }
 0x347   : > { %v2242_v44 = vmul.f32 %v3094_v42, %v3094_v42 }
 0x349   : > { %2968 = vmatmul.mubr.f32.vlgmr.msra.gmra.mrb[36].mxu1 %v2242_v44 }
 0x41c   : > { %v2326_v25 = vpop.f32.mrb[36].mxu1 }
 0x41d   : > { %v2327_v45 = vadd.f32 %v2326_v25, %v2259_v28  ;;  %v2969_v46 = vpop.f32.mrb[37].mxu1 }
 0x41f   : > { %3199 = vrsqrt.f32 %v2327_v45 }
 0x429   : > { %v3200_v47 = vpop.eup %3199 }
 0x42a   : > { %v2331_v56 = vmul.f32 %v3200_v47, %v3094_v42 }
 0x42c   : > { %v2333_v36 = vmul.f32 %v2332_v50, %v2331_v56 }
 0x42e   : > { %v2334_v51 = vsel %vm1782_vm5, %v2333_v36, 0.0 }
 0x42f   : > { %2335 = vadd.xlane.f32.xlu0 %v2334_v51 }
 0x4bc   : > { %v2336_v52 = vpop.xlane.xlu0 %2335 }
 0x4bd   : > { %v2338_v53 = vadd.f32 %v2337_v57, %v2336_v52 }
 0x4bf   : > { %2340 = vst.msk [vmem:[%s384_s12] sm:$0x1] %vm2339_vm8, %v2338_v53 }
 0x4c0 PF: > { %s23_s19 = sadd.s32 1, %s3207_s19  }
 0x4c1   : > { %p20_p4 = scmp.ge.s32.totalorder %s23_s19, 27  }
 0x4c3   :  { %22 = sbr.rel (!%p20_p4) target bundleno = 3 (0x3), region = 97 }

</bundles_post_ra>
